<compile_context>
chip_gen: v5e
topology: v5e:2x2
jax: 0.10.0
libtpu: 0.0.40
codegen_flags: <defaults>
</compile_context>

<pallas_src>
import functools
import math

import numpy as np
import jax
import jax.numpy as jnp
from jax import lax
from jax.experimental import pallas as pl
from jax.experimental.pallas import tpu as pltpu


def _attention_block_kernel(x_ref, gamma_ref, beta_ref, w1t_ref, w2t_ref,
                            cos_ref, sin_ref, out_ref, qkv_sc, o_sc,
                            *, num_heads: int, head_dim: int,
                            heads_per_group: int, eps: float):
    """One batch element per grid step. All compute done in-kernel."""
    x = x_ref[0]                       # (S, E) f32
    S, E = x.shape
    h = num_heads
    e = head_dim
    eh = e // 2
    E2 = E // 2
    hpg = heads_per_group
    gw = hpg * e                       # lane width of one head-group store

    # ---- LayerNorm (f32, biased variance, eps inside rsqrt) ----
    mu = jnp.mean(x, axis=-1, keepdims=True)
    xc = x - mu
    var = jnp.mean(xc * xc, axis=-1, keepdims=True)
    z = xc * lax.rsqrt(var + eps) * gamma_ref[...] + beta_ref[...]   # (S, E) f32

    # ---- QKV projection: bf16 operands, f32 accumulation on the MXU ----
    # W1^T columns pre-permuted to the global half-split RoPE layout; Q columns
    # already carry the 1/sqrt(head_dim) attention scale (folded host-side).
    qkv = jnp.dot(z.astype(jnp.bfloat16), w1t_ref[...],
                  preferred_element_type=jnp.float32)                # (S, 3E) f32

    cos = cos_ref[...]                 # (S, E/2) f32, shared by both halves
    sin = sin_ref[...]                 # (S, E/2) f32

    # ---- RoPE on the whole Q / K slabs (global half-split column layout) ----
    #   out_even = x_even*cos - x_odd*sin ;  out_odd = x_odd*cos + x_even*sin
    # Pure VPU work on half-width tables; results land in bf16 scratch in the
    # same half-split layout the per-head score matmuls read back.
    def rope_store(base, t):
        te = t[:, :E2]
        to = t[:, E2:]
        qkv_sc[:, base:base + E2] = (te * cos - to * sin).astype(jnp.bfloat16)
        qkv_sc[:, base + E2:base + E] = (to * cos + te * sin).astype(jnp.bfloat16)

    rope_store(0, qkv[:, :E])                                   # Q (pre-scaled)
    rope_store(E, qkv[:, E:2 * E])                               # K
    qkv_sc[:, 2 * E:3 * E] = qkv[:, 2 * E:].astype(jnp.bfloat16)  # V (unpermuted)

    # ---- per-head attention, processed in >=128-lane head groups ----
    dn = (((1,), (1,)), ((), ()))      # contract last dims: q @ k^T
    for g in range(h // hpg):
        outs = []
        for j in range(hpg):
            head = g * hpg + j
            lo = head * eh
            # head's q/k live in two contiguous half-split column groups; sum
            # two K=e/2 MXU matmuls in f32 instead of concatenating operands.
            qe = qkv_sc[:, lo:lo + eh]
            qo = qkv_sc[:, E2 + lo:E2 + lo + eh]
            ke = qkv_sc[:, E + lo:E + lo + eh]
            ko = qkv_sc[:, E + E2 + lo:E + E2 + lo + eh]
            vh = qkv_sc[:, 2 * E + head * e:2 * E + (head + 1) * e]  # (S, e) bf16

            s = lax.dot_general(qe, ke, dn, preferred_element_type=jnp.float32)
            s = s + lax.dot_general(qo, ko, dn, preferred_element_type=jnp.float32)

            # softmax with deferred normalization: normalize the (S, e) output
            # (EUP approx reciprocal), not the (S, S) probabilities.
            m = jnp.max(s, axis=-1, keepdims=True)
            p = jnp.exp(s - m)                                       # (S, S) f32
            inv_l = pl.reciprocal(jnp.sum(p, axis=-1, keepdims=True), approx=True)
            oh = jnp.dot(p.astype(jnp.bfloat16), vh,
                         preferred_element_type=jnp.float32)         # (S, e) f32
            outs.append(oh * inv_l)

        slab = outs[0] if hpg == 1 else jnp.concatenate(outs, axis=-1)
        o_sc[:, g * gw:(g + 1) * gw] = slab.astype(jnp.bfloat16)     # lane-dense

    # ---- single output projection (K = E) + residual; dropout(p=0) = id ----
    proj = jnp.dot(o_sc[...], w2t_ref[...], preferred_element_type=jnp.float32)
    out_ref[0] = (x + proj).astype(out_ref.dtype)


def _vmem_limit_bytes():
    """Per-generation VMEM budget with headroom (None -> compiler default)."""
    try:
        kind = jax.devices()[0].device_kind.lower()
    except Exception:
        return None
    if "v7" in kind:
        return 52 * 1024 * 1024        # 64 MiB physical: leave compiler headroom
    if "v5" in kind or "v6" in kind:
        return 104 * 1024 * 1024       # 128 MiB physical: use most of it
    return None


def attention_block(x, gamma, beta, w1, w2, *, num_heads: int, eps: float = 1e-5):
    """x: (B, S, E) f32.  w1: (3E, E), w2: (E, E) as in nn.Linear (out, in)."""
    B, S, E = x.shape
    h = num_heads
    assert E % h == 0, "embedding dimension must be divisible by num_heads"
    e = E // h
    assert e % 2 == 0, "RoPE requires an even head dimension"
    eh = e // 2
    E2 = E // 2
    scale = 1.0 / (float(e) ** 0.5)

    # --- W1^T with Q/K column groups permuted interleaved -> global half-split
    #     first E/2 new columns = per-head even RoPE dims, last E/2 = odd dims.
    #     The attention scale is folded into the Q columns (RoPE is linear, so
    #     rope(c*q) == c*rope(q): exact).
    w1t = jnp.asarray(w1, jnp.float32).T                       # (E, 3E)
    base = np.repeat(np.arange(h) * e, eh) + 2 * np.tile(np.arange(eh), h)
    perm = np.concatenate([base, base + 1])                    # (E,)
    cols = np.concatenate([perm, E + perm, 2 * E + np.arange(E)])
    w1t_p = w1t[:, cols]
    w1t_p = w1t_p.at[:, :E].multiply(scale).astype(jnp.bfloat16)   # (E, 3E) bf16
    w2t = jnp.asarray(w2, jnp.float32).T.astype(jnp.bfloat16)      # (E, E)  bf16

    # --- Half-width RoPE tables (S, E/2), tiled across heads ---
    exponent = jnp.arange(0, e, 2, dtype=jnp.float32) / e
    theta = 1.0 / jnp.power(10000.0, exponent)                 # (e//2,)
    pos = jnp.arange(S, dtype=jnp.float32)
    ang = pos[:, None] * theta[None, :]                        # (S, e//2)
    cos_half = jnp.tile(jnp.cos(ang), (1, h))                  # (S, E//2)
    sin_half = jnp.tile(jnp.sin(ang), (1, h))                  # (S, E//2)

    gamma2 = jnp.asarray(gamma, jnp.float32).reshape(1, E)
    beta2 = jnp.asarray(beta, jnp.float32).reshape(1, E)

    # Heads per lane-dense output store group (>=128 lanes when possible).
    heads_per_group = math.gcd(h, max(1, 128 // e))

    kernel = functools.partial(_attention_block_kernel, num_heads=h, head_dim=e,
                               heads_per_group=heads_per_group, eps=eps)

    def _invariant(shape):
        """Grid-invariant operand: constant index_map, single-buffered."""
        index_map = lambda b: (0,) * len(shape)
        try:
            return pl.BlockSpec(shape, index_map, pipeline_mode=pl.Buffered(1))
        except Exception:
            return pl.BlockSpec(shape, index_map)

    return pl.pallas_call(
        kernel,
        out_shape=jax.ShapeDtypeStruct((B, S, E), jnp.float32),
        grid_spec=pltpu.PrefetchScalarGridSpec(
            num_scalar_prefetch=0,
            grid=(B,),
            in_specs=[
                pl.BlockSpec((1, S, E), lambda b: (b, 0, 0)),    # x
                _invariant((1, E)),                              # gamma
                _invariant((1, E)),                              # beta
                _invariant((E, 3 * E)),                          # W1^T (perm+scaled)
                _invariant((E, E)),                              # W2^T
                _invariant((S, E2)),                             # cos half-table
                _invariant((S, E2)),                             # sin half-table
            ],
            out_specs=pl.BlockSpec((1, S, E), lambda b: (b, 0, 0)),
            scratch_shapes=[
                pltpu.VMEM((S, 3 * E), jnp.bfloat16),            # roped q, k + v
                pltpu.VMEM((S, E), jnp.bfloat16),                # head-group outputs
            ],
        ),
        compiler_params=pltpu.CompilerParams(
            dimension_semantics=("parallel",),
            vmem_limit_bytes=_vmem_limit_bytes(),
        ),
    )(x, gamma2, beta2, w1t_p, w2t, cos_half, sin_half)


# ---------------- pure-JAX f32 reference (correctness sanity check) ----------------
def _reference(x, gamma, beta, w1, w2, *, num_heads: int, eps: float = 1e-5):
    B, S, E = x.shape
    e = E // num_heads
    mu = jnp.mean(x, axis=-1, keepdims=True)
    var = jnp.mean((x - mu) ** 2, axis=-1, keepdims=True)
    z = (x - mu) / jnp.sqrt(var + eps) * gamma + beta
    qkv = jnp.einsum('bse,fe->bsf', z, w1)                     # (B, S, 3E)
    qkv = qkv.reshape(B, S, 3, num_heads, e).transpose(2, 0, 3, 1, 4)
    q, k, v = qkv[0], qkv[1], qkv[2]                           # (B, h, S, e)

    exponent = jnp.arange(0, e, 2, dtype=jnp.float32) / e
    theta = 1.0 / jnp.power(10000.0, exponent)
    enc = jnp.repeat(jnp.arange(S, dtype=jnp.float32)[:, None] * theta[None, :], 2, -1)

    def rope(t):
        tr = t.reshape(B, num_heads, S, e // 2, 2)
        t1, t2 = tr[..., 0], tr[..., 1]
        rh = jnp.stack((-t2, t1), axis=-1).reshape(B, num_heads, S, e)
        return t * jnp.cos(enc) + rh * jnp.sin(enc)

    q, k = rope(q), rope(k)
    s = jnp.einsum('bhqe,bhke->bhqk', q, k) / jnp.sqrt(e)
    p = jax.nn.softmax(s, axis=-1)
    o = jnp.einsum('bhqk,bhke->bhqe', p, v)
    o = o.transpose(0, 2, 1, 3).reshape(B, S, E)
    o = jnp.einsum('bse,fe->bsf', o, w2)
    return x + o


if __name__ == "__main__":
    # Lane-dense small shapes: E multiple of 128, S multiple of 8.
    B, S, E, H = 2, 16, 128, 4

    key = jax.random.PRNGKey(0)
    kx, kg, kb, k1, k2 = jax.random.split(key, 5)
    x = jax.random.normal(kx, (B, S, E), jnp.float32)
    gamma = 1.0 + 0.1 * jax.random.normal(kg, (E,), jnp.float32)
    beta = 0.1 * jax.random.normal(kb, (E,), jnp.float32)
    w1 = jax.random.normal(k1, (3 * E, E), jnp.float32) * (1.0 / jnp.sqrt(E))
    w2 = jax.random.normal(k2, (E, E), jnp.float32) * (1.0 / jnp.sqrt(E))

    out = attention_block(x, gamma, beta, w1, w2, num_heads=H)
    out = jax.block_until_ready(out)

    ref = _reference(x, gamma, beta, w1, w2, num_heads=H)
    assert out.shape == (B, S, E)
    # bf16 matmul operands + approx softmax reciprocal -> loose tolerance vs f32 ref.
    max_err = float(jnp.max(jnp.abs(out - ref)))
    assert jnp.allclose(out, ref, atol=1.5e-1, rtol=5e-2), f"mismatch: max_err={max_err}"

    print("KERNEL_OK")
</pallas_src>

<mosaic_0001>
module attributes {stable_mosaic.version = 11 : i64} {
  func.func @_attention_block_kernel(%arg0: i32, %arg1: memref<1x16x128xf32, #tpu.memory_space<vmem>>, %arg2: memref<1x128xf32, #tpu.memory_space<vmem>>, %arg3: memref<1x128xf32, #tpu.memory_space<vmem>>, %arg4: memref<128x384xbf16, #tpu.memory_space<vmem>>, %arg5: memref<128x128xbf16, #tpu.memory_space<vmem>>, %arg6: memref<16x64xf32, #tpu.memory_space<vmem>>, %arg7: memref<16x64xf32, #tpu.memory_space<vmem>>, %arg8: memref<1x16x128xf32, #tpu.memory_space<vmem>>, %arg9: memref<16x384xbf16, #tpu.memory_space<vmem>>, %arg10: memref<16x128xbf16, #tpu.memory_space<vmem>>) attributes {dimension_semantics = [#tpu.dimension_semantics<parallel>], iteration_bounds = array<i64: 2>, scalar_prefetch = 0 : i64, scratch_operands = 2 : i64, tpu.core_type = #tpu.core_type<tc>, window_params = [{transform_indices = @transform_0, window_bounds = array<i64: 1, 16, 128>}, {pipeline_mode = #tpu.pipeline_mode<synchronous>, transform_indices = @transform_1, window_bounds = array<i64: 1, 128>}, {pipeline_mode = #tpu.pipeline_mode<synchronous>, transform_indices = @transform_2, window_bounds = array<i64: 1, 128>}, {pipeline_mode = #tpu.pipeline_mode<synchronous>, transform_indices = @transform_3, window_bounds = array<i64: 128, 384>}, {pipeline_mode = #tpu.pipeline_mode<synchronous>, transform_indices = @transform_4, window_bounds = array<i64: 128, 128>}, {pipeline_mode = #tpu.pipeline_mode<synchronous>, transform_indices = @transform_5, window_bounds = array<i64: 16, 64>}, {pipeline_mode = #tpu.pipeline_mode<synchronous>, transform_indices = @transform_6, window_bounds = array<i64: 16, 64>}, {transform_indices = @transform_7, window_bounds = array<i64: 1, 16, 128>}]} {
    %c0 = arith.constant 0 : index
    %c0_0 = arith.constant 0 : index
    %c0_1 = arith.constant 0 : index
    %0 = vector.load %arg1[%c0, %c0_0, %c0_1] : memref<1x16x128xf32, #tpu.memory_space<vmem>>, vector<1x16x128xf32>
    %1 = vector.shape_cast %0 : vector<1x16x128xf32> to vector<16x128xf32>
    %cst = arith.constant dense<0.000000e+00> : vector<16xf32>
    %2 = vector.multi_reduction <add>, %1, %cst [1] : vector<16x128xf32> to vector<16xf32>
    %3 = vector.shape_cast %2 : vector<16xf32> to vector<16x1xf32>
    %cst_2 = arith.constant 1.280000e+02 : f32
    %4 = vector.broadcast %cst_2 : f32 to vector<16x1xf32>
    %5 = arith.divf %3, %4 : vector<16x1xf32>
    %6 = vector.broadcast %5 : vector<16x1xf32> to vector<16x128xf32>
    %7 = arith.subf %1, %6 : vector<16x128xf32>
    %8 = arith.mulf %7, %7 : vector<16x128xf32>
    %cst_3 = arith.constant dense<0.000000e+00> : vector<16xf32>
    %9 = vector.multi_reduction <add>, %8, %cst_3 [1] : vector<16x128xf32> to vector<16xf32>
    %10 = vector.shape_cast %9 : vector<16xf32> to vector<16x1xf32>
    %cst_4 = arith.constant 1.280000e+02 : f32
    %11 = vector.broadcast %cst_4 : f32 to vector<16x1xf32>
    %12 = arith.divf %10, %11 : vector<16x1xf32>
    %cst_5 = arith.constant 9.99999974E-6 : f32
    %13 = vector.broadcast %cst_5 : f32 to vector<16x1xf32>
    %14 = arith.addf %12, %13 : vector<16x1xf32>
    %15 = math.rsqrt %14 : vector<16x1xf32>
    %16 = vector.broadcast %15 : vector<16x1xf32> to vector<16x128xf32>
    %17 = arith.mulf %7, %16 : vector<16x128xf32>
    %c0_6 = arith.constant 0 : index
    %c0_7 = arith.constant 0 : index
    %18 = vector.load %arg2[%c0_6, %c0_7] : memref<1x128xf32, #tpu.memory_space<vmem>>, vector<1x128xf32>
    %19 = vector.broadcast %18 : vector<1x128xf32> to vector<16x128xf32>
    %20 = arith.mulf %17, %19 : vector<16x128xf32>
    %c0_8 = arith.constant 0 : index
    %c0_9 = arith.constant 0 : index
    %21 = vector.load %arg3[%c0_8, %c0_9] : memref<1x128xf32, #tpu.memory_space<vmem>>, vector<1x128xf32>
    %22 = vector.broadcast %21 : vector<1x128xf32> to vector<16x128xf32>
    %23 = arith.addf %20, %22 : vector<16x128xf32>
    %24 = arith.truncf %23 : vector<16x128xf32> to vector<16x128xbf16>
    %c0_10 = arith.constant 0 : index
    %c0_11 = arith.constant 0 : index
    %25 = vector.load %arg4[%c0_10, %c0_11] : memref<128x384xbf16, #tpu.memory_space<vmem>>, vector<128x384xbf16>
    %cst_12 = arith.constant dense<0.000000e+00> : vector<16x384xf32>
    %26 = tpu.matmul %24, %25, %cst_12 {dimension_numbers = #tpu.dot_dimension_numbers<[1], [0], [0], [1], [0, 0, 1, 1], [], []>} : vector<16x128xbf16>, vector<128x384xbf16>, vector<16x384xf32> -> vector<16x384xf32>
    %c0_13 = arith.constant 0 : index
    %c0_14 = arith.constant 0 : index
    %27 = vector.load %arg6[%c0_13, %c0_14] : memref<16x64xf32, #tpu.memory_space<vmem>>, vector<16x64xf32>
    %c0_15 = arith.constant 0 : index
    %c0_16 = arith.constant 0 : index
    %28 = vector.load %arg7[%c0_15, %c0_16] : memref<16x64xf32, #tpu.memory_space<vmem>>, vector<16x64xf32>
    %29 = vector.extract_strided_slice %26 {offsets = [0, 0], sizes = [16, 128], strides = [1, 1]} : vector<16x384xf32> to vector<16x128xf32>
    %30 = vector.extract_strided_slice %29 {offsets = [0, 0], sizes = [16, 64], strides = [1, 1]} : vector<16x128xf32> to vector<16x64xf32>
    %31 = vector.extract_strided_slice %29 {offsets = [0, 64], sizes = [16, 64], strides = [1, 1]} : vector<16x128xf32> to vector<16x64xf32>
    %32 = arith.mulf %30, %27 : vector<16x64xf32>
    %33 = arith.mulf %31, %28 : vector<16x64xf32>
    %34 = arith.subf %32, %33 : vector<16x64xf32>
    %35 = arith.truncf %34 : vector<16x64xf32> to vector<16x64xbf16>
    %c0_17 = arith.constant 0 : index
    %c0_18 = arith.constant 0 : index
    %36 = vector.load %arg9[%c0_17, %c0_18] : memref<16x384xbf16, #tpu.memory_space<vmem>>, vector<16x64xbf16>
    tpu.vector_store %arg9[%c0_17, %c0_18], %35 {strides = array<i32>} : memref<16x384xbf16, #tpu.memory_space<vmem>>, vector<16x64xbf16>,
    %37 = arith.mulf %31, %27 : vector<16x64xf32>
    %38 = arith.mulf %30, %28 : vector<16x64xf32>
    %39 = arith.addf %37, %38 : vector<16x64xf32>
    %40 = arith.truncf %39 : vector<16x64xf32> to vector<16x64xbf16>
    %c0_19 = arith.constant 0 : index
    %c64 = arith.constant 64 : index
    %41 = vector.load %arg9[%c0_19, %c64] : memref<16x384xbf16, #tpu.memory_space<vmem>>, vector<16x64xbf16>
    tpu.vector_store %arg9[%c0_19, %c64], %40 {strides = array<i32>} : memref<16x384xbf16, #tpu.memory_space<vmem>>, vector<16x64xbf16>,
    %42 = vector.extract_strided_slice %26 {offsets = [0, 128], sizes = [16, 128], strides = [1, 1]} : vector<16x384xf32> to vector<16x128xf32>
    %43 = vector.extract_strided_slice %42 {offsets = [0, 0], sizes = [16, 64], strides = [1, 1]} : vector<16x128xf32> to vector<16x64xf32>
    %44 = vector.extract_strided_slice %42 {offsets = [0, 64], sizes = [16, 64], strides = [1, 1]} : vector<16x128xf32> to vector<16x64xf32>
    %45 = arith.mulf %43, %27 : vector<16x64xf32>
    %46 = arith.mulf %44, %28 : vector<16x64xf32>
    %47 = arith.subf %45, %46 : vector<16x64xf32>
    %48 = arith.truncf %47 : vector<16x64xf32> to vector<16x64xbf16>
    %c0_20 = arith.constant 0 : index
    %c128 = arith.constant 128 : index
    %49 = vector.load %arg9[%c0_20, %c128] : memref<16x384xbf16, #tpu.memory_space<vmem>>, vector<16x64xbf16>
    tpu.vector_store %arg9[%c0_20, %c128], %48 {strides = array<i32>} : memref<16x384xbf16, #tpu.memory_space<vmem>>, vector<16x64xbf16>,
    %50 = arith.mulf %44, %27 : vector<16x64xf32>
    %51 = arith.mulf %43, %28 : vector<16x64xf32>
    %52 = arith.addf %50, %51 : vector<16x64xf32>
    %53 = arith.truncf %52 : vector<16x64xf32> to vector<16x64xbf16>
    %c0_21 = arith.constant 0 : index
    %c192 = arith.constant 192 : index
    %54 = vector.load %arg9[%c0_21, %c192] : memref<16x384xbf16, #tpu.memory_space<vmem>>, vector<16x64xbf16>
    tpu.vector_store %arg9[%c0_21, %c192], %53 {strides = array<i32>} : memref<16x384xbf16, #tpu.memory_space<vmem>>, vector<16x64xbf16>,
    %55 = vector.extract_strided_slice %26 {offsets = [0, 256], sizes = [16, 128], strides = [1, 1]} : vector<16x384xf32> to vector<16x128xf32>
    %56 = arith.truncf %55 : vector<16x128xf32> to vector<16x128xbf16>
    %c0_22 = arith.constant 0 : index
    %c256 = arith.constant 256 : index
    %57 = vector.load %arg9[%c0_22, %c256] : memref<16x384xbf16, #tpu.memory_space<vmem>>, vector<16x128xbf16>
    tpu.vector_store %arg9[%c0_22, %c256], %56 {strides = array<i32>} : memref<16x384xbf16, #tpu.memory_space<vmem>>, vector<16x128xbf16>,
    %c0_23 = arith.constant 0 : index
    %c0_24 = arith.constant 0 : index
    %58 = vector.load %arg9[%c0_23, %c0_24] : memref<16x384xbf16, #tpu.memory_space<vmem>>, vector<16x16xbf16>
    %c0_25 = arith.constant 0 : index
    %c64_26 = arith.constant 64 : index
    %59 = vector.load %arg9[%c0_25, %c64_26] : memref<16x384xbf16, #tpu.memory_space<vmem>>, vector<16x16xbf16>
    %c0_27 = arith.constant 0 : index
    %c128_28 = arith.constant 128 : index
    %60 = vector.load %arg9[%c0_27, %c128_28] : memref<16x384xbf16, #tpu.memory_space<vmem>>, vector<16x16xbf16>
    %c0_29 = arith.constant 0 : index
    %c192_30 = arith.constant 192 : index
    %61 = vector.load %arg9[%c0_29, %c192_30] : memref<16x384xbf16, #tpu.memory_space<vmem>>, vector<16x16xbf16>
    %c0_31 = arith.constant 0 : index
    %c256_32 = arith.constant 256 : index
    %62 = vector.load %arg9[%c0_31, %c256_32] : memref<16x384xbf16, #tpu.memory_space<vmem>>, vector<16x32xbf16>
    %cst_33 = arith.constant dense<0.000000e+00> : vector<16x16xf32>
    %63 = tpu.matmul %58, %60, %cst_33 {dimension_numbers = #tpu.dot_dimension_numbers<[1], [1], [0], [0], [0, 0, 1, 0], [], []>} : vector<16x16xbf16>, vector<16x16xbf16>, vector<16x16xf32> -> vector<16x16xf32>
    %cst_34 = arith.constant dense<0.000000e+00> : vector<16x16xf32>
    %64 = tpu.matmul %59, %61, %cst_34 {dimension_numbers = #tpu.dot_dimension_numbers<[1], [1], [0], [0], [0, 0, 1, 0], [], []>} : vector<16x16xbf16>, vector<16x16xbf16>, vector<16x16xf32> -> vector<16x16xf32>
    %65 = arith.addf %63, %64 : vector<16x16xf32>
    %cst_35 = arith.constant dense<0xFF800000> : vector<16xf32>
    %66 = vector.multi_reduction <maximumf>, %65, %cst_35 [1] : vector<16x16xf32> to vector<16xf32>
    %67 = vector.shape_cast %66 : vector<16xf32> to vector<16x1xf32>
    %68 = vector.broadcast %67 : vector<16x1xf32> to vector<16x16xf32>
    %69 = arith.subf %65, %68 : vector<16x16xf32>
    %70 = math.exp %69 : vector<16x16xf32>
    %cst_36 = arith.constant dense<0.000000e+00> : vector<16xf32>
    %71 = vector.multi_reduction <add>, %70, %cst_36 [1] : vector<16x16xf32> to vector<16xf32>
    %72 = vector.shape_cast %71 : vector<16xf32> to vector<16x1xf32>
    %73 = tpu.reciprocal %72 {approx = true} : vector<16x1xf32> -> vector<16x1xf32>
    %74 = arith.truncf %70 : vector<16x16xf32> to vector<16x16xbf16>
    %cst_37 = arith.constant dense<0.000000e+00> : vector<16x32xf32>
    %75 = tpu.matmul %74, %62, %cst_37 {dimension_numbers = #tpu.dot_dimension_numbers<[1], [0], [0], [1], [0, 0, 1, 1], [], []>} : vector<16x16xbf16>, vector<16x32xbf16>, vector<16x32xf32> -> vector<16x32xf32>
    %76 = vector.broadcast %73 : vector<16x1xf32> to vector<16x32xf32>
    %77 = arith.mulf %75, %76 : vector<16x32xf32>
    %c0_38 = arith.constant 0 : index
    %c16 = arith.constant 16 : index
    %78 = vector.load %arg9[%c0_38, %c16] : memref<16x384xbf16, #tpu.memory_space<vmem>>, vector<16x16xbf16>
    %c0_39 = arith.constant 0 : index
    %c80 = arith.constant 80 : index
    %79 = vector.load %arg9[%c0_39, %c80] : memref<16x384xbf16, #tpu.memory_space<vmem>>, vector<16x16xbf16>
    %c0_40 = arith.constant 0 : index
    %c144 = arith.constant 144 : index
    %80 = vector.load %arg9[%c0_40, %c144] : memref<16x384xbf16, #tpu.memory_space<vmem>>, vector<16x16xbf16>
    %c0_41 = arith.constant 0 : index
    %c208 = arith.constant 208 : index
    %81 = vector.load %arg9[%c0_41, %c208] : memref<16x384xbf16, #tpu.memory_space<vmem>>, vector<16x16xbf16>
    %c0_42 = arith.constant 0 : index
    %c288 = arith.constant 288 : index
    %82 = vector.load %arg9[%c0_42, %c288] : memref<16x384xbf16, #tpu.memory_space<vmem>>, vector<16x32xbf16>
    %cst_43 = arith.constant dense<0.000000e+00> : vector<16x16xf32>
    %83 = tpu.matmul %78, %80, %cst_43 {dimension_numbers = #tpu.dot_dimension_numbers<[1], [1], [0], [0], [0, 0, 1, 0], [], []>} : vector<16x16xbf16>, vector<16x16xbf16>, vector<16x16xf32> -> vector<16x16xf32>
    %cst_44 = arith.constant dense<0.000000e+00> : vector<16x16xf32>
    %84 = tpu.matmul %79, %81, %cst_44 {dimension_numbers = #tpu.dot_dimension_numbers<[1], [1], [0], [0], [0, 0, 1, 0], [], []>} : vector<16x16xbf16>, vector<16x16xbf16>, vector<16x16xf32> -> vector<16x16xf32>
    %85 = arith.addf %83, %84 : vector<16x16xf32>
    %cst_45 = arith.constant dense<0xFF800000> : vector<16xf32>
    %86 = vector.multi_reduction <maximumf>, %85, %cst_45 [1] : vector<16x16xf32> to vector<16xf32>
    %87 = vector.shape_cast %86 : vector<16xf32> to vector<16x1xf32>
    %88 = vector.broadcast %87 : vector<16x1xf32> to vector<16x16xf32>
    %89 = arith.subf %85, %88 : vector<16x16xf32>
    %90 = math.exp %89 : vector<16x16xf32>
    %cst_46 = arith.constant dense<0.000000e+00> : vector<16xf32>
    %91 = vector.multi_reduction <add>, %90, %cst_46 [1] : vector<16x16xf32> to vector<16xf32>
    %92 = vector.shape_cast %91 : vector<16xf32> to vector<16x1xf32>
    %93 = tpu.reciprocal %92 {approx = true} : vector<16x1xf32> -> vector<16x1xf32>
    %94 = arith.truncf %90 : vector<16x16xf32> to vector<16x16xbf16>
    %cst_47 = arith.constant dense<0.000000e+00> : vector<16x32xf32>
    %95 = tpu.matmul %94, %82, %cst_47 {dimension_numbers = #tpu.dot_dimension_numbers<[1], [0], [0], [1], [0, 0, 1, 1], [], []>} : vector<16x16xbf16>, vector<16x32xbf16>, vector<16x32xf32> -> vector<16x32xf32>
    %96 = vector.broadcast %93 : vector<16x1xf32> to vector<16x32xf32>
    %97 = arith.mulf %95, %96 : vector<16x32xf32>
    %c0_48 = arith.constant 0 : index
    %c32 = arith.constant 32 : index
    %98 = vector.load %arg9[%c0_48, %c32] : memref<16x384xbf16, #tpu.memory_space<vmem>>, vector<16x16xbf16>
    %c0_49 = arith.constant 0 : index
    %c96 = arith.constant 96 : index
    %99 = vector.load %arg9[%c0_49, %c96] : memref<16x384xbf16, #tpu.memory_space<vmem>>, vector<16x16xbf16>
    %c0_50 = arith.constant 0 : index
    %c160 = arith.constant 160 : index
    %100 = vector.load %arg9[%c0_50, %c160] : memref<16x384xbf16, #tpu.memory_space<vmem>>, vector<16x16xbf16>
    %c0_51 = arith.constant 0 : index
    %c224 = arith.constant 224 : index
    %101 = vector.load %arg9[%c0_51, %c224] : memref<16x384xbf16, #tpu.memory_space<vmem>>, vector<16x16xbf16>
    %c0_52 = arith.constant 0 : index
    %c320 = arith.constant 320 : index
    %102 = vector.load %arg9[%c0_52, %c320] : memref<16x384xbf16, #tpu.memory_space<vmem>>, vector<16x32xbf16>
    %cst_53 = arith.constant dense<0.000000e+00> : vector<16x16xf32>
    %103 = tpu.matmul %98, %100, %cst_53 {dimension_numbers = #tpu.dot_dimension_numbers<[1], [1], [0], [0], [0, 0, 1, 0], [], []>} : vector<16x16xbf16>, vector<16x16xbf16>, vector<16x16xf32> -> vector<16x16xf32>
    %cst_54 = arith.constant dense<0.000000e+00> : vector<16x16xf32>
    %104 = tpu.matmul %99, %101, %cst_54 {dimension_numbers = #tpu.dot_dimension_numbers<[1], [1], [0], [0], [0, 0, 1, 0], [], []>} : vector<16x16xbf16>, vector<16x16xbf16>, vector<16x16xf32> -> vector<16x16xf32>
    %105 = arith.addf %103, %104 : vector<16x16xf32>
    %cst_55 = arith.constant dense<0xFF800000> : vector<16xf32>
    %106 = vector.multi_reduction <maximumf>, %105, %cst_55 [1] : vector<16x16xf32> to vector<16xf32>
    %107 = vector.shape_cast %106 : vector<16xf32> to vector<16x1xf32>
    %108 = vector.broadcast %107 : vector<16x1xf32> to vector<16x16xf32>
    %109 = arith.subf %105, %108 : vector<16x16xf32>
    %110 = math.exp %109 : vector<16x16xf32>
    %cst_56 = arith.constant dense<0.000000e+00> : vector<16xf32>
    %111 = vector.multi_reduction <add>, %110, %cst_56 [1] : vector<16x16xf32> to vector<16xf32>
    %112 = vector.shape_cast %111 : vector<16xf32> to vector<16x1xf32>
    %113 = tpu.reciprocal %112 {approx = true} : vector<16x1xf32> -> vector<16x1xf32>
    %114 = arith.truncf %110 : vector<16x16xf32> to vector<16x16xbf16>
    %cst_57 = arith.constant dense<0.000000e+00> : vector<16x32xf32>
    %115 = tpu.matmul %114, %102, %cst_57 {dimension_numbers = #tpu.dot_dimension_numbers<[1], [0], [0], [1], [0, 0, 1, 1], [], []>} : vector<16x16xbf16>, vector<16x32xbf16>, vector<16x32xf32> -> vector<16x32xf32>
    %116 = vector.broadcast %113 : vector<16x1xf32> to vector<16x32xf32>
    %117 = arith.mulf %115, %116 : vector<16x32xf32>
    %c0_58 = arith.constant 0 : index
    %c48 = arith.constant 48 : index
    %118 = vector.load %arg9[%c0_58, %c48] : memref<16x384xbf16, #tpu.memory_space<vmem>>, vector<16x16xbf16>
    %c0_59 = arith.constant 0 : index
    %c112 = arith.constant 112 : index
    %119 = vector.load %arg9[%c0_59, %c112] : memref<16x384xbf16, #tpu.memory_space<vmem>>, vector<16x16xbf16>
    %c0_60 = arith.constant 0 : index
    %c176 = arith.constant 176 : index
    %120 = vector.load %arg9[%c0_60, %c176] : memref<16x384xbf16, #tpu.memory_space<vmem>>, vector<16x16xbf16>
    %c0_61 = arith.constant 0 : index
    %c240 = arith.constant 240 : index
    %121 = vector.load %arg9[%c0_61, %c240] : memref<16x384xbf16, #tpu.memory_space<vmem>>, vector<16x16xbf16>
    %c0_62 = arith.constant 0 : index
    %c352 = arith.constant 352 : index
    %122 = vector.load %arg9[%c0_62, %c352] : memref<16x384xbf16, #tpu.memory_space<vmem>>, vector<16x32xbf16>
    %cst_63 = arith.constant dense<0.000000e+00> : vector<16x16xf32>
    %123 = tpu.matmul %118, %120, %cst_63 {dimension_numbers = #tpu.dot_dimension_numbers<[1], [1], [0], [0], [0, 0, 1, 0], [], []>} : vector<16x16xbf16>, vector<16x16xbf16>, vector<16x16xf32> -> vector<16x16xf32>
    %cst_64 = arith.constant dense<0.000000e+00> : vector<16x16xf32>
    %124 = tpu.matmul %119, %121, %cst_64 {dimension_numbers = #tpu.dot_dimension_numbers<[1], [1], [0], [0], [0, 0, 1, 0], [], []>} : vector<16x16xbf16>, vector<16x16xbf16>, vector<16x16xf32> -> vector<16x16xf32>
    %125 = arith.addf %123, %124 : vector<16x16xf32>
    %cst_65 = arith.constant dense<0xFF800000> : vector<16xf32>
    %126 = vector.multi_reduction <maximumf>, %125, %cst_65 [1] : vector<16x16xf32> to vector<16xf32>
    %127 = vector.shape_cast %126 : vector<16xf32> to vector<16x1xf32>
    %128 = vector.broadcast %127 : vector<16x1xf32> to vector<16x16xf32>
    %129 = arith.subf %125, %128 : vector<16x16xf32>
    %130 = math.exp %129 : vector<16x16xf32>
    %cst_66 = arith.constant dense<0.000000e+00> : vector<16xf32>
    %131 = vector.multi_reduction <add>, %130, %cst_66 [1] : vector<16x16xf32> to vector<16xf32>
    %132 = vector.shape_cast %131 : vector<16xf32> to vector<16x1xf32>
    %133 = tpu.reciprocal %132 {approx = true} : vector<16x1xf32> -> vector<16x1xf32>
    %134 = arith.truncf %130 : vector<16x16xf32> to vector<16x16xbf16>
    %cst_67 = arith.constant dense<0.000000e+00> : vector<16x32xf32>
    %135 = tpu.matmul %134, %122, %cst_67 {dimension_numbers = #tpu.dot_dimension_numbers<[1], [0], [0], [1], [0, 0, 1, 1], [], []>} : vector<16x16xbf16>, vector<16x32xbf16>, vector<16x32xf32> -> vector<16x32xf32>
    %136 = vector.broadcast %133 : vector<16x1xf32> to vector<16x32xf32>
    %137 = arith.mulf %135, %136 : vector<16x32xf32>
    %138 = tpu.concatenate %77, %97, %117, %137 in 1 : vector<16x32xf32>, vector<16x32xf32>, vector<16x32xf32>, vector<16x32xf32> -> vector<16x128xf32>
    %139 = arith.truncf %138 : vector<16x128xf32> to vector<16x128xbf16>
    %c0_68 = arith.constant 0 : index
    %c0_69 = arith.constant 0 : index
    %140 = vector.load %arg10[%c0_68, %c0_69] : memref<16x128xbf16, #tpu.memory_space<vmem>>, vector<16x128xbf16>
    tpu.vector_store %arg10[%c0_68, %c0_69], %139 {strides = array<i32>} : memref<16x128xbf16, #tpu.memory_space<vmem>>, vector<16x128xbf16>,
    %c0_70 = arith.constant 0 : index
    %c0_71 = arith.constant 0 : index
    %141 = vector.load %arg10[%c0_70, %c0_71] : memref<16x128xbf16, #tpu.memory_space<vmem>>, vector<16x128xbf16>
    %c0_72 = arith.constant 0 : index
    %c0_73 = arith.constant 0 : index
    %142 = vector.load %arg5[%c0_72, %c0_73] : memref<128x128xbf16, #tpu.memory_space<vmem>>, vector<128x128xbf16>
    %cst_74 = arith.constant dense<0.000000e+00> : vector<16x128xf32>
    %143 = tpu.matmul %141, %142, %cst_74 {dimension_numbers = #tpu.dot_dimension_numbers<[1], [0], [0], [1], [0, 0, 1, 1], [], []>} : vector<16x128xbf16>, vector<128x128xbf16>, vector<16x128xf32> -> vector<16x128xf32>
    %144 = arith.addf %1, %143 : vector<16x128xf32>
    %c0_75 = arith.constant 0 : index
    %c0_76 = arith.constant 0 : index
    %c0_77 = arith.constant 0 : index
    %145 = vector.load %arg8[%c0_75, %c0_76, %c0_77] : memref<1x16x128xf32, #tpu.memory_space<vmem>>, vector<1x16x128xf32>
    %146 = vector.shape_cast %145 : vector<1x16x128xf32> to vector<16x128xf32>
    %147 = vector.shape_cast %144 : vector<16x128xf32> to vector<1x16x128xf32>
    tpu.vector_store %arg8[%c0_75, %c0_76, %c0_77], %147 {strides = array<i32>} : memref<1x16x128xf32, #tpu.memory_space<vmem>>, vector<1x16x128xf32>,
    return
  }
  func.func @transform_0(%arg0: i32) -> (i32, i32, i32) {
    %c0_i32 = arith.constant 0 : i32
    %c0_i32_0 = arith.constant 0 : i32
    %c0_i32_1 = arith.constant 0 : i32
    return %arg0, %c0_i32, %c0_i32_0 : i32, i32, i32
  }
  func.func @transform_1(%arg0: i32) -> (i32, i32) {
    %c0_i32 = arith.constant 0 : i32
    %c0_i32_0 = arith.constant 0 : i32
    %c0_i32_1 = arith.constant 0 : i32
    return %c0_i32, %c0_i32_0 : i32, i32
  }
  func.func @transform_2(%arg0: i32) -> (i32, i32) {
    %c0_i32 = arith.constant 0 : i32
    %c0_i32_0 = arith.constant 0 : i32
    %c0_i32_1 = arith.constant 0 : i32
    return %c0_i32, %c0_i32_0 : i32, i32
  }
  func.func @transform_3(%arg0: i32) -> (i32, i32) {
    %c0_i32 = arith.constant 0 : i32
    %c0_i32_0 = arith.constant 0 : i32
    %c0_i32_1 = arith.constant 0 : i32
    return %c0_i32, %c0_i32_0 : i32, i32
  }
  func.func @transform_4(%arg0: i32) -> (i32, i32) {
    %c0_i32 = arith.constant 0 : i32
    %c0_i32_0 = arith.constant 0 : i32
    %c0_i32_1 = arith.constant 0 : i32
    return %c0_i32, %c0_i32_0 : i32, i32
  }
  func.func @transform_5(%arg0: i32) -> (i32, i32) {
    %c0_i32 = arith.constant 0 : i32
    %c0_i32_0 = arith.constant 0 : i32
    %c0_i32_1 = arith.constant 0 : i32
    return %c0_i32, %c0_i32_0 : i32, i32
  }
  func.func @transform_6(%arg0: i32) -> (i32, i32) {
    %c0_i32 = arith.constant 0 : i32
    %c0_i32_0 = arith.constant 0 : i32
    %c0_i32_1 = arith.constant 0 : i32
    return %c0_i32, %c0_i32_0 : i32, i32
  }
  func.func @transform_7(%arg0: i32) -> (i32, i32, i32) {
    %c0_i32 = arith.constant 0 : i32
    %c0_i32_0 = arith.constant 0 : i32
    %c0_i32_1 = arith.constant 0 : i32
    return %arg0, %c0_i32, %c0_i32_0 : i32, i32, i32
  }
}

</mosaic_0001>

<bundles_post_ra>
// kernel: tpu_custom_call.1
= control target key start
LH: loop header
LB: loop body
LE: loop exit
PB: predicated region body
PF: predicated region fallthrough
CT: control target
= control target key end

     0   :  { %s2442_s0 = inlined_call_operand.hbm [shape: f32[2,16,128], index: 0, kind: input, shape index: {}]   ;;  %s2443_s1 = inlined_call_operand.hbm [shape: f32[1,128], index: 1, kind: input, shape index: {}]   ;;  %s2444_s2 = inlined_call_operand.vmem [shape: f32[1,128], index: 2, kind: input, shape index: {}]   ;;  %s2445_s3 = inlined_call_operand.hbm [shape: bf16[128,384], index: 3, kind: input, shape index: {}]   ;;  %s2446_s4 = inlined_call_operand.hbm [shape: bf16[128,128], index: 4, kind: input, shape index: {}]   ;;  %s2447_s5 = inlined_call_operand.hbm [shape: f32[16,64], index: 5, kind: input, shape index: {}]   ;;  %s2448_s6 = inlined_call_operand.hbm [shape: f32[16,64], index: 6, kind: input, shape index: {}]   ;;  %s2449_s7 = inlined_call_operand.hbm [shape: f32[2,16,128], index: 7, kind: output, shape index: {}]  }
   0x1   :  { %2452 = sst [smem:[#allocation21_spill]] %s2443_s1 }
   0x2   :  { %12 = vsyncpa [#allocation5], 0 }
   0x3   :  { %14 = vsyncpa [#allocation5 + $0x1], 0 }
   0x4   :  { %15 = vsyncpa [#allocation8], 0 }
   0x5   :  { %16 = vsyncpa [#allocation11], 0 }
   0x6   :  { %17 = vsyncpa [#allocation14], 0 }
   0x7   :  { %18 = vsyncpa [#allocation6], 0 }
   0x8   :  { %20 = vsyncpa [#allocation6 + $0x1], 0  ;;  %s2100_s24 = smov 0   ;;  %s2102_s25 = smov 0  }
   0x9   :  { %s2104_s26 = smov 0   ;;  %s2106_s27 = smov 0  }
   0xa LB: > { %s2453_s1 = sld [smem:[#allocation21_spill]]  ;;  %s2124_s8 = sadd.s32 4294967295, %s2037_s27   ;;  %s2037_s27 = sphi %s2106_s27, %s2466_s27   ;;  %s2033_s26 = sphi %s2104_s26, %s2465_s26   ;;  %s2029_s25 = sphi %s2102_s25, %s2464_s25   ;;  %s2025_s24 = sphi %s2100_s24, %s2463_s24  }
   0xb   : > { %p1388_p0 = scmp.ge.s32.totalorder %s2037_s27, 1  ;;  %p47_p1 = scmp.eq.s32.totalorder %s2124_s8, 0 }
   0xc   : > { %p209_p2 = scmp.lt.s32.totalorder %s2037_s27, 3  ;;  %s2039_s10 = smov [#allocation7]  }
   0xd   : > { %s223_s11 = sshll.u32 %s2039_s10, 4  ;;  %s249_s14 = sshll.u32 %s2446_s4, 4  ;;  %s224_s11 = int_to_ptr.vmem [resolvable:$true] %s223_s11  ;;  %s250_s14 = int_to_ptr.hbm [resolvable:$true] %s249_s14 }
   0xe   : > { %p2129_p3 = pnand %p1388_p0, %p209_p2  ;;  %s2040_s16 = smov [#allocation10]  }
   0xf   : > { %s251_s17 = sshll.u32 %s2040_s16, 4  ;;  %s2041_s18 = smov 64   ;;  %s252_s17 = int_to_ptr.vmem [resolvable:$true] %s251_s17 }
  0x10   : > { %s221_s30 = sshll.u32 %s2453_s1, 4  ;;  %p1634_p5 = pneg %p2129_p3  ;;  %s222_s30 = int_to_ptr.hbm [resolvable:$true] %s221_s30 }
  0x11   : > { %s2042_s19 = smov 4   ;;  %s235_s22 = sshll.u32 %s2445_s3, 4  ;;  %s236_s22 = int_to_ptr.hbm [resolvable:$true] %s235_s22 }
  0x12   : > { %p2141_p6 = pnand %p1634_p5, %p47_p1  ;;  %s2043_s23 = smov [#allocation9]  }
  0x13   : > { %s237_s28 = sshll.u32 %s2043_s23, 4  ;;  %s263_s12 = sshll.u32 %s2447_s5, 4  ;;  %s238_s28 = int_to_ptr.vmem [resolvable:$true] %s237_s28  ;;  %s264_s12 = int_to_ptr.hbm [resolvable:$true] %s263_s12 }
  0x14   : > { %1637 = dma.hbm_to_vmem [thread:$0]  (!%p2141_p6), %s222_s30, 16, %s224_s11, [#allocation8]  }
  0x15   : > { %1643 = dma.hbm_to_vmem [thread:$0]  (!%p2141_p6), %s250_s14, 1024, %s252_s17, [#allocation11], %s2041_s18, %s2041_s18, %s2042_s19  }
  0x16   : > { %s2044_s13 = smov 192   ;;  %s2045_s30 = smov 12  }
  0x17   : > { %1640 = dma.hbm_to_vmem [thread:$0]  (!%p2141_p6), %s236_s22, 3072, %s238_s28, [#allocation8], %s2044_s13, %s2044_s13, %s2045_s30  }
  0x18   : > { %s2046_s11 = smov [#allocation12]   ;;  %s2450_s16 = smov 128  }
  0x19   : > { %s265_s14 = sshll.u32 %s2046_s11, 4  ;;  %s2451_s17 = smov 8   ;;  %s266_s14 = int_to_ptr.vmem [resolvable:$true] %s265_s14 }
  0x1a   : > { %1646 = dma.hbm_to_vmem [thread:$0]  (!%p2141_p6), %s264_s12, 256, %s266_s14, [#allocation11], %s2450_s16, %s2450_s16, %s2451_s17  }
  0x1b   : > { %s277_s20 = sshll.u32 %s2448_s6, 4  ;;  %s2049_s21 = smov [#allocation13]   ;;  %s278_s20 = int_to_ptr.hbm [resolvable:$true] %s277_s20 }
  0x1c   : > { %s279_s22 = sshll.u32 %s2049_s21, 4  ;;  %s1387_s23 = sadd.s32 4294967294, %s2037_s27   ;;  %s280_s22 = int_to_ptr.vmem [resolvable:$true] %s279_s22 }
  0x1d   : > { %1649 = dma.hbm_to_vmem [thread:$0]  (!%p2141_p6), %s278_s20, 256, %s280_s22, [#allocation14], %s2450_s16, %s2450_s16, %s2451_s17  }
  0x1e   : > { %s2172_s28 = sadd.s32 1, %s2037_s27   ;;  %s33_s29 = sadd.s32 1, %s2033_s26 }
  0x1f   : > { %s30_s10 = ssub.s32 %s2037_s27, %s2172_s28  ;;  %p40_p7 = scmp.ne.s32.totalorder %s2033_s26, %s2029_s25 }
  0x20   : > { %p31_p8 = scmp.eq.s32.totalorder %s30_s10, 0  ;;  %p41_p9 = scmp.eq.s32.totalorder %s2037_s27, 0 }
  0x21   : > { %p46_p10 = scmp.ne.s32.totalorder %s2029_s25, %s2025_s24  ;;  %p196_p11 = scmp.eq.s32.totalorder %s2124_s8, 1 }
  0x22   : > { %s2184_s12 = scalar_select %p31_p8, %s2033_s26, %s33_s29  }
  0x23   : > { %p2188_p12 = por %p47_p1, %p46_p10  ;;  %p2192_p13 = por %p196_p11, %p40_p7 }
  0x24   : > { %p202_p0 = scmp.eq.s32.totalorder %s1387_s23, 1  ;;  %p42_p2 = por %p41_p9, %p40_p7 }
  0x25   : > { %s293_s30 = sand.u32 1, %s2033_s26   ;;  %p1663_p6 = scmp.lt.s32.totalorder %s2037_s27, 2 }
  0x26   : > { %p2197_p5 = por %p202_p0, %p46_p10  ;;  %s1395_s14 = sshll.u32 %s293_s30, 4 }
  0x27   : > { %s1567_s18 = sshll.u32 %s2037_s27, 4  ;;  %s297_s29 = scalar_lea.vmem [#allocation4], %s1395_s14 }
  0x28   : > { %s302_s21 = scalar_lea.hbm %s2442_s0, %s1567_s18  ;;  %s305_s10 = sshll.u32 %s297_s29, 4  ;;  %s306_s10 = int_to_ptr.vmem [resolvable:$true] %s305_s10 }
  0x29   : > { %s303_s22 = sshll.u32 %s302_s21, 4  ;;  %p2206_p8 = pnand %p1663_p6, %p42_p2  ;;  %s304_s22 = int_to_ptr.hbm [resolvable:$true] %s303_s22 }
  0x2a   : > { %s294_s16 = scalar_lea.sflag [#allocation5], %s293_s30  ;;  %s1929_s17 = sshra.s32 %s304_s22, 4  ;;  %s1930_s17 = int_to_ptr.hbm [resolvable:$true] %s1929_s17 }
  0x2b   : > { %s1931_s1 = scalar_lea.hbm %s1930_s17, 16  ;;  %p1933_p9 = pneg %p2206_p8 }
  0x2c   : > { %p1932_p7 = scmp.ne.s32.totalorder %s1930_s17, %s1931_s1  ;;  %s1936_s14 = scalar_lea.hbm %s2442_s0, 32 }
  0x2d   : > { %p1937_p0 = scmp.lt.s32.totalorder %s1930_s17, %s2442_s0  ;;  %p1938_p2 = scmp.lt.s32.totalorder %s1936_s14, %s1931_s1 }
  0x2e   : > { %p1934_p10 = pnand %p1933_p9, %p1932_p7 }
  0x2f   : > { %p1939_p6 = por %p1938_p2, %p1937_p0 }
  0x30   : > { %p1935_p11 = pneg %p1934_p10 }
  0x32   : > { %p1940_p4 = pnand %p1939_p6, %p1935_p11 }
  0x34   : > { %1943 = shalt.err (!%p1940_p4)
}
  0x35   : > { %s2460_s30 = smov 8   ;;  %s2461_s29 = smov 128  }
  0x36   : > { %1653 = dma.hbm_to_vmem [thread:$0]  (!%p2206_p8), %s304_s22, 256, %s306_s10, %s294_s16, %s2461_s29, %s2461_s29, %s2460_s30  }
  0x37   : > { %317 = sbr.rel (%p2129_p3) target bundleno = 1717 (0x6b5), region = 48  ;;  %s2226_s18 = sand.u32 (!%p2129_p3), 1, %s2029_s25  }
  0x38   : > { %s1399_s1 = sshll.u32 (!%p2129_p3), %s2226_s18, 4  ;;  %s320_s17 = scalar_lea.sflag (!%p2129_p3), [#allocation5], %s2226_s18 }
  0x39   : > { %s2232_s19 = scalar_lea.vmem (!%p2129_p3), [#allocation4], %s1399_s1 }
  0x3c   : > { %2004 = dma.done.wait (%p2188_p12), %s320_s17, 256  }
  0x3d   : > { %2006 = vsyncadd (%p2188_p12), %s320_s17, 4294967040 }
  0x3e   : > { %2008 = dma.done.wait (%p47_p1), [#allocation8], 3088  }
  0x3f   : > { %2010 = vsyncadd (%p47_p1), [#allocation8], 4294964208 }
  0x40   : > { %2012 = dma.done.wait (%p47_p1), [#allocation11], 1280  }
  0x41   : > { %2014 = vsyncadd (%p47_p1), [#allocation11], 4294966016 }
  0x42   : > { %2016 = dma.done.wait (%p47_p1), [#allocation14], 256  }
  0x43   : > { %2018 = vsyncadd (%p47_p1), [#allocation14], 4294967040  ;;  %v2251_v0 = vld [vmem:[%s2232_s19] sm:$0xff]  ;;  %v382_v1 = vld [vmem:[%s2232_s19 + $0x8] sm:$0xff]  ;;  %v2050_v2 = vmov 128.0   ;;  %s2051_s9 = smov 64  }
  0x44   : > { %383 = vadd.xlane.f32.xlu0 %v2251_v0  ;;  %1740 = vrcp.f32 %v2050_v2  ;;  %v1492_v17 = vld [vmem:[#allocation9 + $0xa8] sm:$0xf]  ;;  %v1590_v18 = vld [vmem:[#allocation9 + $0xb0] sm:$0xf0]  ;;  %v1589_v19 = vld [vmem:[#allocation9 + $0xac] sm:$0xf] }
  0x45   : > { %v1493_v20 = vor.u32 %v1590_v18, %v1492_v17  ;;  %v1494_v21 = vld [vmem:[#allocation9 + $0xb4] sm:$0xf0]  ;;  %v1500_v22 = vld [vmem:[#allocation9 + $0xb0] sm:$0xf]  ;;  %v1591_v23 = vld [vmem:[#allocation9 + $0xb8] sm:$0xf0] }
  0x46   : > { %v1497_v24 = vor.u32 %v1589_v19, %v1494_v21  ;;  %v1501_v25 = vor.u32 %v1591_v23, %v1500_v22  ;;  %v1480_v26 = vld [vmem:[#allocation9 + $0x90] sm:$0xf]  ;;  %v1587_v27 = vld [vmem:[#allocation9 + $0x98] sm:$0xf0]  ;;  %v1586_v28 = vld [vmem:[#allocation9 + $0x94] sm:$0xf] }
  0x47   : > { %603 = vmatpush.bf16.msra.mxu0 %v1493_v20  ;;  %v1481_v29 = vor.u32 %v1587_v27, %v1480_v26  ;;  %v1482_v30 = vld [vmem:[#allocation9 + $0x9c] sm:$0xf0]  ;;  %v1488_v31 = vld [vmem:[#allocation9 + $0x98] sm:$0xf]  ;;  %v1588_v32 = vld [vmem:[#allocation9 + $0xa0] sm:$0xf0] }
  0x48   : > { %617 = vmatpush.bf16.msra.mxu1 %v1497_v24  ;;  %631 = vmatpush.bf16.msra.mxu2 %v1501_v25  ;;  %v1485_v33 = vor.u32 %v1586_v28, %v1482_v30  ;;  %v1489_v34 = vor.u32 %v1588_v32, %v1488_v31  ;;  %v1468_v35 = vld [vmem:[#allocation9 + $0x78] sm:$0xf]  ;;  %v1584_v36 = vld [vmem:[#allocation9 + $0x80] sm:$0xf0]  ;;  %v1583_v37 = vld [vmem:[#allocation9 + $0x7c] sm:$0xf] }
  0x49   : > { %v1469_v38 = vor.u32 %v1584_v36, %v1468_v35  ;;  %v1470_v39 = vld [vmem:[#allocation9 + $0x84] sm:$0xf0]  ;;  %v1476_v40 = vld [vmem:[#allocation9 + $0x80] sm:$0xf]  ;;  %v1585_v41 = vld [vmem:[#allocation9 + $0x88] sm:$0xf0] }
  0x4a   : > { %v1741_v3 = vpop.eup %1740  ;;  %v1473_v42 = vor.u32 %v1583_v37, %v1470_v39  ;;  %v1477_v43 = vor.u32 %v1585_v41, %v1476_v40  ;;  %v1456_v44 = vld [vmem:[#allocation9 + $0x60] sm:$0xf]  ;;  %v1581_v45 = vld [vmem:[#allocation9 + $0x68] sm:$0xf0]  ;;  %v1580_v46 = vld [vmem:[#allocation9 + $0x64] sm:$0xf] }
  0x4b   : > { %v388_v4 = vmul.f32 128.0, %v1741_v3  ;;  %vm392_vm0 = vweird.f32 %v1741_v3  ;;  %604 = vmatpush.bf16.msra.mxu0 %v1481_v29  ;;  %v1457_v47 = vor.u32 %v1581_v45, %v1456_v44  ;;  %v1458_v48 = vld [vmem:[#allocation9 + $0x6c] sm:$0xf0]  ;;  %v1464_v49 = vld [vmem:[#allocation9 + $0x68] sm:$0xf]  ;;  %v648_v41 = vld [vmem:[#allocation13 + $0x8] sm:$0xff] }
  0x4c   : > { %385 = vadd.xlane.f32.xlu0 %v382_v1  ;;  %618 = vmatpush.bf16.msra.mxu1 %v1485_v33  ;;  %v1582_v50 = vld [vmem:[#allocation9 + $0x70] sm:$0xf0]  ;;  %v1461_v51 = vor.u32 %v1580_v46, %v1458_v48  ;;  %v1444_v53 = vld [vmem:[#allocation9 + $0x48] sm:$0xf]  ;;  %v1577_v55 = vld [vmem:[#allocation9 + $0x4c] sm:$0xf] }
  0x4d   : > { %v389_v5 = vsub.f32 1.0, %v388_v4  ;;  %632 = vmatpush.bf16.msra.mxu2 %v1489_v34  ;;  %v1465_v52 = vor.u32 %v1582_v50, %v1464_v49  ;;  %v1578_v54 = vld [vmem:[#allocation9 + $0x50] sm:$0xf0]  ;;  %v1446_v57 = vld [vmem:[#allocation9 + $0x54] sm:$0xf0]  ;;  %v2269_v33 = vld [vmem:[#allocation12] sm:$0xff] }
  0x4e   : > { %v1445_v56 = vor.u32 %v1578_v54, %v1444_v53  ;;  %v1452_v58 = vld [vmem:[#allocation9 + $0x50] sm:$0xf]  ;;  %v1579_v59 = vld [vmem:[#allocation9 + $0x58] sm:$0xf0]  ;;  %v1449_v60 = vor.u32 %v1577_v55, %v1446_v57  ;;  %v1440_v4 = vld [vmem:[#allocation9 + $0x38] sm:$0xf] }
  0x4f   : > { %v390_v6 = vmul.f32 %v1741_v3, %v389_v5  ;;  %605 = vmatpush.bf16.msra.mxu0 %v1469_v38  ;;  %v1453_v61 = vor.u32 %v1579_v59, %v1452_v58  ;;  %v1432_v62 = vld [vmem:[#allocation9 + $0x30] sm:$0xf]  ;;  %v1575_v63 = vld [vmem:[#allocation9 + $0x38] sm:$0xf0]  ;;  %v1576_v5 = vld [vmem:[#allocation9 + $0x40] sm:$0xf0] }
  0x50   : > { %619 = vmatpush.bf16.msra.mxu1 %v1473_v42  ;;  %v1433_v2 = vor.u32 %v1575_v63, %v1432_v62  ;;  %v1573_v17 = vld [vmem:[#allocation9 + $0x28] sm:$0xf0]  ;;  %v1408_v20 = vld [vmem:[#allocation9] sm:$0xf]  ;;  %v1568_v22 = vld [vmem:[#allocation9 + $0x4] sm:$0xf] }
  0x51   : > { %v391_v7 = vadd.f32 %v1741_v3, %v390_v6  ;;  %633 = vmatpush.bf16.msra.mxu2 %v1477_v43  ;;  %v1569_v21 = vld [vmem:[#allocation9 + $0x8] sm:$0xf0]  ;;  %v1410_v25 = vld [vmem:[#allocation9 + $0xc] sm:$0xf0]  ;;  %v1416_v26 = vld [vmem:[#allocation9 + $0x8] sm:$0xf] }
  0x52   : > { %v1409_v24 = vor.u32 %v1569_v21, %v1408_v20  ;;  %v1570_v27 = vld [vmem:[#allocation9 + $0x10] sm:$0xf0]  ;;  %v1413_v29 = vor.u32 %v1568_v22, %v1410_v25  ;;  %v2271_v34 = vld [vmem:[#allocation12 + $0x8] sm:$0xff]  ;;  %vm673_vm7 = vcmask 519168   ;;  %vm700_vm8 = vcmask 1043968   ;;  %s2052_s22 = smov 112  }
  0x53   : > { %v2255_v8 = vsel %vm392_vm0, %v1741_v3, %v391_v7  ;;  %606 = vmatpush.bf16.msra.mxu0 %v1457_v47  ;;  %v1434_v3 = vld [vmem:[#allocation9 + $0x3c] sm:$0xf0]  ;;  %v1441_v7 = vor.u32 %v1576_v5, %v1440_v4  ;;  %v1417_v30 = vor.u32 %v1570_v27, %v1416_v26  ;;  %v647_v35 = vld [vmem:[#allocation13] sm:$0xff]  ;;  %s2053_s10 = smov 48   ;;  %s2054_s23 = smov 96   ;;  %vm763_vm9 = vcmask 130048  }
  0x54   : > { %620 = vmatpush.bf16.msra.mxu1 %v1461_v51  ;;  %653 = vrot.lane.b32.xlu2 %v647_v35, %s2051_s9  ;;  %v1738_v51 = vld [vmem:[#allocation7] ss:$0 sm:$0xff]  ;;  %s2055_s14 = smov 32   ;;  %s2056_s20 = smov 80   ;;  %vm1147_vm10 = vcmask 261120   ;;  %vm1150_vm11 = vcmask 523264  }
  0x55   : > { %634 = vmatpush.bf16.msra.mxu2 %v1465_v52  ;;  %s2057_s21 = smov 16   ;;  %vm1153_vm12 = vcmask 785408   ;;  %s1604_s30 = sshll.u32 %s2124_s8, 4 }
  0x56   : > { %s379_s16 = scalar_lea.vmem [#allocation15], %s1399_s1  ;;  %s1251_s8 = scalar_lea.sflag [#allocation6], %s2226_s18 }
  0x57   : > { %607 = vmatpush.bf16.msra.mxu0 %v1445_v56  ;;  %v1739_v56 = vld [vmem:[%s2444_s2] ss:$0 sm:$0xff]  ;;  %s1263_s15 = sshll.u32 %s379_s16, 4  ;;  %s1979_s1 = scalar_lea.hbm %s2449_s7, 32  ;;  %s1264_s15 = int_to_ptr.vmem [resolvable:$true] %s1263_s15 }
  0x58   : > { %621 = vmatpush.bf16.msra.mxu1 %v1449_v60 }
  0x59   : > { %635 = vmatpush.bf16.msra.mxu2 %v1453_v61 }
  0x5b   : > { %608 = vmatpush.bf16.msra.mxu0 %v1433_v2 }
  0x5c   : > { %655 = vrot.lane.b32.xlu2 %v648_v41, %s2051_s9 }
  0x5d   : > { %636 = vmatpush.bf16.msra.mxu2 %v1441_v7 }
  0x60   : > { %678 = vrot.lane.b32.xlu0 %v2269_v33, %s2051_s9 }
  0xb7   : > { %v384_v9 = vpop.xlane.xlu0 %383 }
  0xb8   : > { %v394_v10 = vmul.f32 %v2255_v8, %v384_v9  ;;  %v1420_v9 = vld [vmem:[#allocation9 + $0x18] sm:$0xf] }
  0xba   : > { %v2259_v11 = vsub.f32 %v2251_v0, %v394_v10  ;;  %v1572_v10 = vld [vmem:[#allocation9 + $0x20] sm:$0xf0] }
  0xbc   : > { %v398_v12 = vmul.f32 %v2259_v11, %v2259_v11 }
  0xbe   : > { %400 = vadd.xlane.f32.xlu1 %v398_v12  ;;  %v1571_v12 = vld [vmem:[#allocation9 + $0x1c] sm:$0xf] }
  0xbf   : > { %v386_v13 = vpop.xlane.xlu0 %385 }
  0xc0   : > { %v395_v14 = vmul.f32 %v2255_v8, %v386_v13  ;;  %v1421_v13 = vor.u32 %v1572_v10, %v1420_v9 }
  0xc2   : > { %v2264_v15 = vsub.f32 %v382_v1, %v395_v14  ;;  %v1574_v1 = vld [vmem:[#allocation9 + $0x34] sm:$0xf]  ;;  %v1422_v14 = vld [vmem:[#allocation9 + $0x24] sm:$0xf0]  ;;  %609 = vmatpush.bf16.msra.mxu0 %v1421_v13 }
  0xc3   : > { %v1437_v6 = vor.u32 %v1574_v1, %v1434_v3  ;;  %v1425_v18 = vor.u32 %v1571_v12, %v1422_v14 }
  0xc4   : > { %v399_v16 = vmul.f32 %v2264_v15, %v2264_v15 }
  0xc5   : > { %622 = vmatpush.bf16.msra.mxu1 %v1437_v6 }
  0xc6   : > { %402 = vadd.xlane.f32.xlu1 %v399_v16  ;;  %v1428_v16 = vld [vmem:[#allocation9 + $0x20] sm:$0xf]  ;;  %610 = vmatpush.bf16.msra.mxu0 %v1409_v24 }
  0xc7   : > { %v1429_v19 = vor.u32 %v1573_v17, %v1428_v16 }
  0xc9   : > { %623 = vmatpush.bf16.msra.mxu1 %v1425_v18  ;;  %637 = vmatpush.bf16.msra.mxu2 %v1429_v19 }
  0xcd   : > { %624 = vmatpush.bf16.msra.mxu1 %v1413_v29  ;;  %638 = vmatpush.bf16.msra.mxu2 %v1417_v30 }
  0xd2   : > { %v679_v21 = vpop.permute.xlu0 %678 }
  0xdf   : > { %680 = vrot.lane.b32.xlu1 %v2271_v34, %s2051_s9 }
 0x131   : > { %v401_v23 = vpop.xlane.xlu1 %400 }
 0x132   : > { %v404_v28 = vmul.f32 %v401_v23, %v2255_v8 }
 0x134   : > { %v406_v31 = vadd.f32 1e-05, %v404_v28 }
 0x136   : > { %1742 = vrsqrt.f32 %v406_v31  ;;  %vm414_vm2 = vweird.f32 %v406_v31 }
 0x139   : > { %v403_v32 = vpop.xlane.xlu1 %402 }
 0x13a   : > { %v405_v36 = vmul.f32 %v403_v32, %v2255_v8 }
 0x13c   : > { %v1743_v37 = vpop.eup %1742  ;;  %v407_v38 = vadd.f32 1e-05, %v405_v36 }
 0x13d   : > { %v409_v39 = vmul.f32 %v1743_v37, %v406_v31  ;;  %vm415_vm1 = vweird.f32 %v1743_v37 }
 0x13e   : > { %1744 = vrsqrt.f32 %v407_v38  ;;  %vm416_vm3 = vmor %vm414_vm2, %vm415_vm1  ;;  %vm424_vm5 = vweird.f32 %v407_v38 }
 0x13f   : > { %v410_v40 = vmul.f32 %v1743_v37, %v409_v39 }
 0x141   : > { %v411_v42 = vmul.f32 0.5, %v410_v40 }
 0x143   : > { %v412_v43 = vsub.f32 1.5, %v411_v42 }
 0x144   : > { %v1745_v8 = vpop.eup %1744 }
 0x145   : > { %v413_v44 = vmul.f32 %v1743_v37, %v412_v43  ;;  %v419_v45 = vmul.f32 %v1745_v8, %v407_v38  ;;  %vm425_vm4 = vweird.f32 %v1745_v8 }
 0x146   : > { %vm426_vm6 = vmor %vm424_vm5, %vm425_vm4 }
 0x147   : > { %v420_v46 = vmul.f32 %v1745_v8, %v419_v45  ;;  %v417_v47 = vsel %vm416_vm3, %v1743_v37, %v413_v44 }
 0x148   : > { %v428_v50 = vmul.f32 %v417_v47, %v2259_v11  ;;  %v654_v11 = vpop.permute.xlu2 %653 }
 0x149   : > { %v421_v48 = vmul.f32 0.5, %v420_v46 }
 0x14a   : > { %v434_v55 = vmul.f32 %v1738_v51, %v428_v50 }
 0x14b   : > { %v422_v49 = vsub.f32 1.5, %v421_v48 }
 0x14c   : > { %v440_v58 = vadd.f32 %v1739_v56, %v434_v55 }
 0x14d   : > { %v423_v52 = vmul.f32 %v1745_v8, %v422_v49 }
 0x14f   : > { %v427_v53 = vsel %vm426_vm6, %v1745_v8, %v423_v52 }
 0x150   : > { %v429_v54 = vmul.f32 %v427_v53, %v2264_v15  ;;  %v656_v15 = vpop.permute.xlu2 %655 }
 0x151   : > { %v681_v32 = vpop.permute.xlu1 %680 }
 0x152   : > { %v435_v57 = vmul.f32 %v1738_v51, %v429_v54 }
 0x154   : > { %v441_v59 = vadd.f32 %v1739_v56, %v435_v57 }
 0x156   : > { %v442_v60 = vpack.c.bf16 %v441_v59, %v440_v58 }
 0x158   : > { %611 = vmatmul.bf16.vlgmr.msra.gmra.mxu0 %v442_v60  ;;  %625 = vmatmul.bf16.vlgmr.msra.gmra.mxu1 %v442_v60 }
 0x159   : > { %639 = vmatmul.bf16.vlgmr.msra.gmra.mxu2 %v442_v60 }
 0x1d5   : > { %v2285_v61 = vpop.f32.mrf.mxu0  ;;  %v626_v62 = vpop.f32.mrf.mxu1 }
 0x1d6   : > { %v705_v63 = vmul.f32 %v654_v11, %v626_v62  ;;  %v723_v5 = vmul.f32 %v647_v35, %v626_v62  ;;  %v686_v13 = vmul.f32 %v647_v35, %v2285_v61  ;;  %v659_v14 = vmul.f32 %v654_v11, %v2285_v61 }
 0x1d7   : > { %v703_v17 = vmul.f32 %v2269_v33, %v626_v62  ;;  %v721_v22 = vmul.f32 %v679_v21, %v626_v62  ;;  %v649_v30 = vmul.f32 %v2269_v33, %v2285_v61  ;;  %v684_v33 = vmul.f32 %v679_v21, %v2285_v61 }
 0x1d8   : > { %709 = vrot.lane.b32.xlu2 %v705_v63, %s2051_s9 }
 0x1dc   : > { %v640_v1 = vpop.f32.mrf.mxu2 }
 0x1dd   : > { %v739_v2 = vpack.c.bf16 %v640_v1, %v640_v1  ;;  %v614_v3 = vpop.f32.mrf.mxu0  ;;  %v628_v4 = vpop.f32.mrf.mxu1 }
 0x1de   : > { %v724_v6 = vmul.f32 %v648_v41, %v628_v4  ;;  %v660_v7 = vmul.f32 %v656_v15, %v614_v3  ;;  %v706_v12 = vmul.f32 %v656_v15, %v628_v4  ;;  %v687_v16 = vmul.f32 %v648_v41, %v614_v3 }
 0x1df   : > { %741 = vst [vmem:[#allocation2 + $0x8] sm:$0xf] %v739_v2  ;;  %v704_v26 = vmul.f32 %v2271_v34, %v628_v4  ;;  %v685_v37 = vmul.f32 %v681_v32, %v614_v3  ;;  %v722_v38 = vmul.f32 %v681_v32, %v628_v4  ;;  %v650_v40 = vmul.f32 %v2271_v34, %v614_v3 }
 0x1e0   : > { %727 = vrot.lane.b32.xlu2 %v723_v5, %s2051_s9  ;;  %729 = vrot.lane.b32.xlu0 %v724_v6, %s2051_s9 }
 0x1e1   : > { %665 = vrot.lane.b32.xlu1 %v660_v7, %s2051_s9 }
 0x1e4   : > { %v642_v9 = vpop.f32.mrf.mxu2 }
 0x1e5   : > { %v740_v10 = vpack.c.bf16 %v642_v9, %v642_v9 }
 0x1e6   : > { %v1514_v57 = vld [vmem:[#allocation2 + $0x8] sm:$0xf] }
 0x1e7   : > { %742 = vst [vmem:[#allocation2 + $0x14] sm:$0xf] %v740_v10 }
 0x1e8   : > { %711 = vrot.lane.b32.xlu2 %v706_v12, %s2051_s9  ;;  %690 = vrot.lane.b32.xlu0 %v686_v13, %s2051_s9 }
 0x1ee   : > { %v1594_v56 = vld [vmem:[#allocation2 + $0x10] sm:$0xf0] }
 0x1ef   : > { %v2322_v58 = vor.u32 %v1594_v56, %v1514_v57 }
 0x1f0   : > { %663 = vrot.lane.b32.xlu2 %v659_v14, %s2051_s9 }
 0x1f8   : > { %692 = vrot.lane.b32.xlu2 %v687_v16, %s2051_s9 }
 0x232   : > { %v710_v18 = vpop.permute.xlu2 %709 }
 0x233   : > { %v715_v19 = vsub.f32 %v703_v17, %v710_v18 }
 0x235   : > { %v717_v20 = vpack.c.bf16 %v715_v19, %v715_v19 }
 0x237   : > { %719 = vst.msk [vmem:[#allocation2 + $0x4] sm:$0xf] %vm673_vm7, %v717_v20 }
 0x23a   : > { %v728_v23 = vpop.permute.xlu2 %727 }
 0x23b   : > { %v733_v24 = vadd.f32 %v728_v23, %v721_v22 }
 0x23d   : > { %v735_v25 = vpack.c.bf16 %v733_v24, %v733_v24 }
 0x23f   : > { %737 = vst.msk [vmem:[#allocation2 + $0x4] sm:$0xf] %vm700_vm8, %v735_v25 }
 0x242   : > { %v712_v27 = vpop.permute.xlu2 %711 }
 0x243   : > { %v716_v28 = vsub.f32 %v704_v26, %v712_v27 }
 0x245   : > { %v718_v29 = vpack.c.bf16 %v716_v28, %v716_v28 }
 0x246   : > { %v1508_v34 = vld [vmem:[#allocation2 + $0x4] sm:$0xf] }
 0x247   : > { %720 = vst.msk [vmem:[#allocation2 + $0x10] sm:$0xf] %vm673_vm7, %v718_v29 }
 0x24a   : > { %v664_v31 = vpop.permute.xlu2 %663 }
 0x24b   : > { %v669_v35 = vsub.f32 %v649_v30, %v664_v31 }
 0x24d   : > { %v671_v36 = vpack.c.bf16 %v669_v35, %v669_v35 }
 0x24f   : > { %674 = vst.msk [vmem:[#allocation2] sm:$0xf] %vm673_vm7, %v671_v36 }
 0x252   : > { %v693_v39 = vpop.permute.xlu2 %692  ;;  %v730_v41 = vpop.permute.xlu0 %729 }
 0x253   : > { %v697_v42 = vadd.f32 %v693_v39, %v685_v37  ;;  %v666_v43 = vpop.permute.xlu1 %665  ;;  %v734_v8 = vadd.f32 %v730_v41, %v722_v38 }
 0x254   : > { %v670_v44 = vsub.f32 %v650_v40, %v666_v43 }
 0x255   : > { %v699_v45 = vpack.c.bf16 %v697_v42, %v697_v42  ;;  %v736_v46 = vpack.c.bf16 %v734_v8, %v734_v8 }
 0x256   : > { %v672_v47 = vpack.c.bf16 %v670_v44, %v670_v44 }
 0x257   : > { %738 = vst.msk [vmem:[#allocation2 + $0x10] sm:$0xf] %vm700_vm8, %v736_v46 }
 0x258   : > { %675 = vst.msk [vmem:[#allocation2 + $0xc] sm:$0xf] %vm673_vm7, %v672_v47 }
 0x259   : > { %702 = vst.msk [vmem:[#allocation2 + $0xc] sm:$0xf] %vm700_vm8, %v699_v45 }
 0x25a   : > { %v691_v48 = vpop.permute.xlu0 %690 }
 0x25b   : > { %v696_v49 = vadd.f32 %v691_v48, %v684_v33 }
 0x25d   : > { %v698_v50 = vpack.c.bf16 %v696_v49, %v696_v49 }
 0x25e   : > { %v1593_v51 = vld [vmem:[#allocation2 + $0xc] sm:$0xf0] }
 0x25f   : > { %701 = vst.msk [vmem:[#allocation2] sm:$0xf] %vm700_vm8, %v698_v50  ;;  %v2311_v52 = vor.u32 %v1593_v51, %v1508_v34 }
 0x260   : > { %v1592_v54 = vld [vmem:[#allocation2 + $0x8] sm:$0xf0] }
 0x261   : > { %876 = vrot.lane.b32.xlu2 %v2311_v52, %s2052_s22  ;;  %761 = vrot.lane.b32.xlu1 %v2311_v52, %s2051_s9  ;;  %v788_v15 = vsel %vm763_vm9, %v2311_v52, 0 }
 0x266   : > { %v1504_v53 = vld [vmem:[#allocation2] sm:$0xf] }
 0x267   : > { %v2316_v55 = vor.u32 %v1592_v54, %v1504_v53 }
 0x269   : > { %852 = vrot.lane.b32.xlu1 %v2311_v52, %s2053_s10  ;;  %850 = vrot.lane.b32.xlu2 %v2316_v55, %s2053_s10 }
 0x26a   : > { %754 = vrot.lane.b32.xlu0 %v2316_v55, %s2051_s9 }
 0x271   : > { %919 = vrot.lane.b32.xlu2 %v2322_v58, %s2054_s23 }
 0x272   : > { %874 = vrot.lane.b32.xlu0 %v2316_v55, %s2052_s22 }
 0x27a   : > { %943 = vrot.lane.b32.xlu0 %v2311_v52, %s2055_s14 }
 0x2bb   : > { %v877_v59 = vpop.permute.xlu2 %876 }
 0x2bc   : > { %v882_v60 = vsel %vm763_vm9, %v877_v59, 0 }
 0x2bd   : > { %891 = vmatpush.bf16.xpose.msrb.mxu2 %v882_v60 }
 0x2c3   : > { %v851_v11 = vpop.permute.xlu2 %850 }
 0x2cb   : > { %v920_v61 = vpop.permute.xlu2 %919 }
 0x2cc   : > { %932 = vmatpush.bf16.msra.mxu2 %v920_v61 }
 0x2d3   : > { %v762_v62 = vpop.permute.xlu1 %761 }
 0x2d4   : > { %v768_v63 = vsel %vm763_vm9, %v762_v62, 0 }
 0x2d5   : > { %777 = vmatpush.bf16.xpose.msra.mxu3 %v768_v63 }
 0x2db   : > { %v853_v1 = vpop.permute.xlu1 %852 }
 0x2dc   : > { %v755_v2 = vpop.permute.xlu0 %754  ;;  %v858_v3 = vsel %vm763_vm9, %v853_v1, 0 }
 0x2dd   : > { %797 = vmatpush.bf16.xpose.msrb.mxu3 %v788_v15  ;;  %867 = vmatpush.bf16.xpose.msrb.mxu0 %v858_v3 }
 0x2de   : > { %1510 = vmatmul.msk.bf16.vlgmr.msra.gmra.mxu3 %vm763_vm9, %v755_v2 }
 0x2e4   : > { %v875_v4 = vpop.permute.xlu0 %874  ;;  %1517 = vmatmul.msk.bf16.vlgmr.msrb.gmra.mxu0 %vm763_vm9, %v851_v11 }
 0x2e5   : > { %841 = vmatpush.bf16.msra.mxu3 %v2322_v58  ;;  %1518 = vmatmul.msk.bf16.vlgmr.msrb.gmra.mxu2 %vm763_vm9, %v875_v4 }
 0x2ec   : > { %v944_v5 = vpop.permute.xlu0 %943 }
 0x2ed   : > { %v949_v6 = vsel %vm763_vm9, %v944_v5, 0 }
 0x2ee   : > { %1511 = vmatmul.msk.bf16.vlgmr.msrb.gmra.mxu3 %vm763_vm9, %v2316_v55 }
 0x2ef   : > { %958 = vmatpush.bf16.xpose.msrb.mxu3 %v949_v6 }
 0x361   : > { %v779_v7 = vpop.f32.mrf.mxu3  ;;  %v869_v9 = vpop.f32.mrf.mxu0 }
 0x368   : > { %v893_v12 = vpop.f32.mrf.mxu2 }
 0x369   : > { %v781_v10 = vpop.f32.mrf.mxu3  ;;  %v894_v13 = vadd.f32 %v893_v12, %v869_v9  ;;  %v871_v16 = vpop.f32.mrf.mxu0 }
 0x36b   : > { %v898_v14 = vsel %vm763_vm9, %v894_v13, -inf }
 0x36c   : > { %899 = vmax.xlane.f32.xlu2 %v898_v14 }
 0x370   : > { %v895_v18 = vpop.f32.mrf.mxu2 }
 0x371   : > { %v799_v17 = vpop.f32.mrf.mxu3  ;;  %v896_v19 = vadd.f32 %v895_v18, %v871_v16 }
 0x372   : > { %v800_v21 = vadd.f32 %v799_v17, %v779_v7 }
 0x373   : > { %v901_v20 = vsel %vm763_vm9, %v896_v19, -inf }
 0x374   : > { %902 = vmax.xlane.f32.xlu1 %v901_v20  ;;  %v804_v25 = vsel %vm763_vm9, %v800_v21, -inf }
 0x379   : > { %v801_v22 = vpop.f32.mrf.mxu3 }
 0x37a   : > { %v802_v23 = vadd.f32 %v801_v22, %v781_v10 }
 0x37c   : > { %v807_v24 = vsel %vm763_vm9, %v802_v23, -inf  ;;  %805 = vmax.xlane.f32.xlu1 %v804_v25 }
 0x37d   : > { %808 = vmax.xlane.f32.xlu0 %v807_v24 }
 0x384   : > { %1058 = vrot.lane.b32.xlu2 %v2311_v52, %s2056_s20 }
 0x38c   : > { %1056 = vrot.lane.b32.xlu2 %v2316_v55, %s2056_s20 }
 0x391   : > { %1034 = vrot.lane.b32.xlu0 %v2311_v52, %s2057_s21 }
 0x395   : > { %941 = vrot.lane.b32.xlu1 %v2316_v55, %s2055_s14 }
 0x399   : > { %967 = vrot.lane.b32.xlu0 %v2311_v52, %s2054_s23 }
 0x39d   : > { %1032 = vrot.lane.b32.xlu1 %v2316_v55, %s2057_s21 }
 0x3a1   : > { %965 = vrot.lane.b32.xlu0 %v2316_v55, %s2054_s23 }
 0x3df   : > { %v900_v26 = vpop.xlane.xlu2 %899 }
 0x3e0   : > { %v904_v27 = vsub.f32 %v894_v13, %v900_v26 }
 0x3e2   : > { %v906_v28 = vmul.f32 1.442695, %v904_v27 }
 0x3e4   : > { %1746 = vpow2.f32 %v906_v28 }
 0x3e7   : > { %v903_v29 = vpop.xlane.xlu1 %902  ;;  %v1059_v44 = vpop.permute.xlu2 %1058 }
 0x3e8   : > { %v905_v30 = vsub.f32 %v896_v19, %v903_v29  ;;  %v1064_v46 = vsel %vm763_vm9, %v1059_v44, 0 }
 0x3ea   : > { %v908_v31 = vmul.f32 1.442695, %v905_v30  ;;  %v1747_v37 = vpop.eup %1746 }
 0x3eb   : > { %v910_v10 = vsel %vm763_vm9, %v1747_v37, 0.0 }
 0x3ec   : > { %1748 = vpow2.f32 %v908_v31 }
 0x3ef   : > { %v806_v32 = vpop.xlane.xlu1 %805  ;;  %v1057_v52 = vpop.permute.xlu2 %1056 }
 0x3f0   : > { %v810_v35 = vsub.f32 %v800_v21, %v806_v32  ;;  %v809_v36 = vpop.xlane.xlu0 %808 }
 0x3f1   : > { %v811_v38 = vsub.f32 %v802_v23, %v809_v36 }
 0x3f2   : > { %v1749_v39 = vpop.eup %1748  ;;  %v812_v40 = vmul.f32 1.442695, %v810_v35 }
 0x3f3   : > { %v918_v41 = vpack.c.bf16 %v1749_v39, %v1747_v37  ;;  %v814_v42 = vmul.f32 1.442695, %v811_v38  ;;  %v913_v12 = vsel %vm763_vm9, %v1749_v39, 0.0 }
 0x3f4   : > { %1750 = vpow2.f32 %v812_v40 }
 0x3f5   : > { %1752 = vpow2.f32 %v814_v42  ;;  %1519 = vmatmul.msk.bf16.vlgmr.msra.gmra.mxu2 %vm763_vm9, %v918_v41 }
 0x3fa   : > { %v2356_v43 = vpop.eup %1750 }
 0x3fb   : > { %v2358_v8 = vpop.eup %1752  ;;  %v816_v27 = vsel %vm763_vm9, %v2356_v43, 0.0 }
 0x3fc   : > { %v824_v45 = vpack.c.bf16 %v2358_v8, %v2356_v43  ;;  %v819_v41 = vsel %vm763_vm9, %v2358_v8, 0.0 }
 0x3fe   : > { %1516 = vmatmul.msk.bf16.vlgmr.msra.gmra.mxu3 %vm763_vm9, %v824_v45 }
 0x3ff   : > { %1073 = vmatpush.bf16.xpose.msra.mxu3 %v1064_v46 }
 0x403   : > { %v1035_v47 = vpop.permute.xlu0 %1034 }
 0x404   : > { %v1040_v33 = vsel %vm763_vm9, %v1035_v47, 0 }
 0x405   : > { %1049 = vmatpush.bf16.xpose.msrb.mxu2 %v1040_v33 }
 0x407   : > { %v942_v48 = vpop.permute.xlu1 %941 }
 0x40b   : > { %v968_v49 = vpop.permute.xlu0 %967 }
 0x40c   : > { %v973_v50 = vsel %vm763_vm9, %v968_v49, 0 }
 0x40d   : > { %982 = vmatpush.bf16.xpose.msra.mxu0 %v973_v50 }
 0x40e   : > { %1520 = vmatmul.msk.bf16.vlgmr.msrb.gmra.mxu3 %vm763_vm9, %v942_v48 }
 0x40f   : > { %v1033_v34 = vpop.permute.xlu1 %1032 }
 0x410   : > { %1523 = vmatmul.msk.bf16.vlgmr.msrb.gmra.mxu2 %vm763_vm9, %v1033_v34 }
 0x413   : > { %v966_v51 = vpop.permute.xlu0 %965 }
 0x414   : > { %1521 = vmatmul.msk.bf16.vlgmr.msra.gmra.mxu0 %vm763_vm9, %v966_v51 }
 0x41e   : > { %1524 = vmatmul.msk.bf16.vlgmr.msra.gmra.mxu3 %vm763_vm9, %v1057_v52  ;;  %v1603_v52 = vld [vmem:[#allocation10 + $0x38] sm:$0xff] }
 0x478   : > { %v2374_v55 = vpop.f32.mrf.mxu2 }
 0x480   : > { %v2377_v11 = vpop.f32.mrf.mxu2 }
 0x481   : > { %v2370_v53 = vpop.f32.mrf.mxu3 }
 0x489   : > { %v2372_v54 = vpop.f32.mrf.mxu3 }
 0x491   : > { %v984_v56 = vpop.f32.mrf.mxu0  ;;  %v960_v57 = vpop.f32.mrf.mxu3 }
 0x492   : > { %v985_v59 = vadd.f32 %v984_v56, %v960_v57 }
 0x493   : > { %v1051_v1 = vpop.f32.mrf.mxu2 }
 0x494   : > { %v989_v60 = vsel %vm763_vm9, %v985_v59, -inf }
 0x495   : > { %990 = vmax.xlane.f32.xlu1 %v989_v60 }
 0x499   : > { %v986_v61 = vpop.f32.mrf.mxu0  ;;  %v962_v62 = vpop.f32.mrf.mxu3 }
 0x49a   : > { %v987_v63 = vadd.f32 %v986_v61, %v962_v62 }
 0x49b   : > { %v1053_v5 = vpop.f32.mrf.mxu2 }
 0x49c   : > { %v992_v15 = vsel %vm763_vm9, %v987_v63, -inf }
 0x49d   : > { %993 = vmax.xlane.f32.xlu2 %v992_v15 }
 0x4a1   : > { %v1075_v2 = vpop.f32.mrf.mxu3 }
 0x4a2   : > { %v1076_v3 = vadd.f32 %v1075_v2, %v1051_v1 }
 0x4a4   : > { %v1080_v4 = vsel %vm763_vm9, %v1076_v3, -inf }
 0x4a5   : > { %1081 = vmax.xlane.f32.xlu0 %v1080_v4  ;;  %v1601_v4 = vld [vmem:[#allocation10 + $0x28] sm:$0xff] }
 0x4a9   : > { %v1077_v6 = vpop.f32.mrf.mxu3 }
 0x4aa   : > { %v1078_v7 = vadd.f32 %v1077_v6, %v1053_v5  ;;  %v1600_v5 = vld [vmem:[#allocation10 + $0x20] sm:$0xff]  ;;  %v1599_v6 = vld [vmem:[#allocation10 + $0x18] sm:$0xff] }
 0x4ac   : > { %v1083_v9 = vsel %vm763_vm9, %v1078_v7, -inf }
 0x4ad   : > { %1084 = vmax.xlane.f32.xlu1 %v1083_v9  ;;  %v1597_v9 = vld [vmem:[#allocation10 + $0x8] sm:$0xff] }
 0x4b5   : > { %1010 = vrot.lane.b32.xlu2 %v2322_v58, %s2051_s9  ;;  %911 = vadd.xlane.f32.xlu1 %v910_v10  ;;  %v1596_v10 = vld [vmem:[#allocation10] sm:$0xff] }
 0x4b9   : > { %1101 = vrot.lane.b32.xlu0 %v2322_v58, %s2055_s14 }
 0x4bd   : > { %914 = vadd.xlane.f32.xlu1 %v913_v12 }
 0x508   : > { %v991_v13 = vpop.xlane.xlu1 %990 }
 0x509   : > { %v995_v14 = vsub.f32 %v985_v59, %v991_v13  ;;  %v1602_v59 = vld [vmem:[#allocation10 + $0x30] sm:$0xff] }
 0x50b   : > { %v997_v16 = vmul.f32 1.442695, %v995_v14 }
 0x50d   : > { %1754 = vpow2.f32 %v997_v16 }
 0x510   : > { %v994_v17 = vpop.xlane.xlu2 %993 }
 0x511   : > { %v996_v18 = vsub.f32 %v987_v63, %v994_v17 }
 0x513   : > { %v1755_v19 = vpop.eup %1754  ;;  %v999_v20 = vmul.f32 1.442695, %v996_v18 }
 0x514   : > { %v1001_v21 = vsel %vm763_vm9, %v1755_v19, 0.0 }
 0x515   : > { %1756 = vpow2.f32 %v999_v20  ;;  %1002 = vadd.xlane.f32.xlu1 %v1001_v21 }
 0x518   : > { %v1011_v22 = vpop.permute.xlu2 %1010  ;;  %v1082_v23 = vpop.xlane.xlu0 %1081 }
 0x519   : > { %v1086_v24 = vsub.f32 %v1076_v3, %v1082_v23  ;;  %1023 = vmatpush.bf16.msrb.mxu1 %v1011_v22 }
 0x51b   : > { %v1757_v58 = vpop.eup %1756  ;;  %v1088_v25 = vmul.f32 1.442695, %v1086_v24 }
 0x51c   : > { %v1004_v26 = vsel %vm763_vm9, %v1757_v58, 0.0  ;;  %v1009_v28 = vpack.c.bf16 %v1757_v58, %v1755_v19 }
 0x51d   : > { %1758 = vpow2.f32 %v1088_v25  ;;  %1005 = vadd.xlane.f32.xlu0 %v1004_v26  ;;  %817 = vadd.xlane.f32.xlu1 %v816_v27 }
 0x51e   : > { %1522 = vmatmul.msk.bf16.vlgmr.msrb.gmra.mxu1 %vm763_vm9, %v1009_v28 }
 0x51f   : > { %1232 = vmatpush.bf16.msra.mxu1 %v1603_v52 }
 0x520   : > { %v1085_v29 = vpop.xlane.xlu1 %1084 }
 0x521   : > { %v1087_v30 = vsub.f32 %v1078_v7, %v1085_v29  ;;  %v1598_v7 = vld [vmem:[#allocation10 + $0x10] sm:$0xff] }
 0x523   : > { %v1759_v31 = vpop.eup %1758  ;;  %v1090_v32 = vmul.f32 1.442695, %v1087_v30  ;;  %1233 = vmatpush.bf16.msra.mxu1 %v1602_v59 }
 0x524   : > { %v1092_v35 = vsel %vm763_vm9, %v1759_v31, 0.0 }
 0x525   : > { %1760 = vpow2.f32 %v1090_v32  ;;  %1093 = vadd.xlane.f32.xlu2 %v1092_v35 }
 0x527   : > { %1234 = vmatpush.bf16.msra.mxu1 %v1601_v4 }
 0x528   : > { %v912_v40 = vpop.xlane.xlu1 %911 }
 0x52b   : > { %v1761_v36 = vpop.eup %1760  ;;  %v1102_v37 = vpop.permute.xlu0 %1101  ;;  %1235 = vmatpush.bf16.msra.mxu1 %v1600_v5 }
 0x52c   : > { %v1100_v38 = vpack.c.bf16 %v1761_v36, %v1759_v31  ;;  %1114 = vmatpush.bf16.msrb.mxu0 %v1102_v37  ;;  %v1095_v39 = vsel %vm763_vm9, %v1761_v36, 0.0  ;;  %v1778_v37 = vld [vmem:[%s2232_s19 + $0x8] sm:$0xff] }
 0x52d   : > { %1096 = vadd.xlane.f32.xlu1 %v1095_v39 }
 0x52f   : > { %1525 = vmatmul.msk.bf16.vlgmr.msrb.gmra.mxu0 %vm763_vm9, %v1100_v38  ;;  %1236 = vmatpush.bf16.msra.mxu1 %v1599_v6 }
 0x530   : > { %v915_v42 = vpop.xlane.xlu1 %914 }
 0x531   : > { %1762 = vrcp.f32 %v915_v42 }
 0x532   : > { %1764 = vrcp.f32 %v912_v40 }
 0x533   : > { %1237 = vmatpush.bf16.msra.mxu1 %v1598_v7 }
 0x535   : > { %820 = vadd.xlane.f32.xlu1 %v819_v41 }
 0x537   : > { %v1763_v43 = vpop.eup %1762  ;;  %1238 = vmatpush.bf16.msra.mxu1 %v1597_v9 }
 0x538   : > { %v1765_v44 = vpop.eup %1764  ;;  %v940_v45 = vmul.f32 %v1763_v43, %v2377_v11 }
 0x539   : > { %v939_v46 = vmul.f32 %v1765_v44, %v2374_v55 }
 0x53b   : > { %v1723_v47 = vpack.i.bf16 %v940_v45, %v939_v46  ;;  %1239 = vmatpush.bf16.msra.mxu1 %v1596_v10 }
 0x54e   : > { %1724 = vrot.lane.b32.xlu1 %v1723_v47, %s2055_s14 }
 0x588   : > { %v1003_v33 = vpop.xlane.xlu1 %1002 }
 0x589   : > { %1766 = vrcp.f32 %v1003_v33 }
 0x58f   : > { %v1767_v50 = vpop.eup %1766 }
 0x590   : > { %v1006_v48 = vpop.xlane.xlu0 %1005  ;;  %v818_v34 = vpop.xlane.xlu1 %817 }
 0x591   : > { %1768 = vrcp.f32 %v1006_v48 }
 0x597   : > { %v1769_v8 = vpop.eup %1768 }
 0x598   : > { %v1094_v55 = vpop.xlane.xlu2 %1093 }
 0x599   : > { %1770 = vrcp.f32 %v1094_v55 }
 0x59b   : > { %v1025_v49 = vpop.f32.mrf.mxu1 }
 0x59c   : > { %v1030_v56 = vmul.f32 %v1767_v50, %v1025_v49 }
 0x59f   : > { %v1771_v62 = vpop.eup %1770 }
 0x5a0   : > { %v1097_v11 = vpop.xlane.xlu1 %1096 }
 0x5a1   : > { %1772 = vrcp.f32 %v1097_v11 }
 0x5a2   : > { %1774 = vrcp.f32 %v818_v34 }
 0x5a3   : > { %v1027_v51 = vpop.f32.mrf.mxu1 }
 0x5a4   : > { %v1031_v57 = vmul.f32 %v1769_v8, %v1027_v51 }
 0x5a6   : > { %v1728_v60 = vpack.i.bf16 %v1031_v57, %v1030_v56 }
 0x5a7   : > { %v1773_v63 = vpop.eup %1772 }
 0x5a8   : > { %1729 = vrot.lane.b32.xlu0 %v1728_v60, %s2051_s9  ;;  %v821_v12 = vpop.xlane.xlu1 %820  ;;  %v1775_v14 = vpop.eup %1774  ;;  %s1262_s9 = scalar_lea.hbm %s2449_s7, %s1604_s30 }
 0x5a9   : > { %1776 = vrcp.f32 %v821_v12  ;;  %v848_v20 = vmul.f32 %v1775_v14, %v2370_v53  ;;  %s1265_s22 = sshll.u32 %s1262_s9, 4  ;;  %s1266_s22 = int_to_ptr.hbm [resolvable:$true] %s1265_s22 }
 0x5aa   : > { %s1973_s10 = sshra.s32 %s1266_s22, 4  ;;  %s1974_s10 = int_to_ptr.hbm [resolvable:$true] %s1973_s10 }
 0x5ab   : > { %p1980_p12 = scmp.lt.s32.totalorder %s1974_s10, %s2449_s7 }
 0x5ac   : > { %v1116_v61 = vpop.f32.mrf.mxu0 }
 0x5ad   : > { %v1121_v1 = vmul.f32 %v1771_v62, %v1116_v61 }
 0x5af   : > { %v1777_v16 = vpop.eup %1776 }
 0x5b0   : > { %v849_v21 = vmul.f32 %v1777_v16, %v2372_v54 }
 0x5b4   : > { %v1118_v15 = vpop.f32.mrf.mxu0 }
 0x5b5   : > { %v1122_v2 = vmul.f32 %v1773_v63, %v1118_v15 }
 0x5b7   : > { %v1733_v3 = vpack.i.bf16 %v1122_v2, %v1121_v1 }
 0x5b9   : > { %1734 = vrot.lane.b32.xlu2 %v1733_v3, %s2054_s23  ;;  %s1975_s23 = scalar_lea.hbm %s1974_s10, 16 }
 0x5ba   : > { %p1976_p1 = scmp.ne.s32.totalorder %s1974_s10, %s1975_s23  ;;  %p1981_p8 = scmp.lt.s32.totalorder %s1979_s1, %s1975_s23 }
 0x5bc   : > { %p1977_p3 = pnand %p1976_p1, %p2192_p13  ;;  %p1982_p7 = por %p1981_p8, %p1980_p12 }
 0x5be   : > { %p1978_p4 = pneg %p1977_p3 }
 0x5c0   : > { %v1725_v13 = vpop.permute.xlu1 %1724  ;;  %p1983_p9 = pnand %p1982_p7, %p1978_p4 }
 0x5c1   : > { %v1727_v17 = vunpack.i.h.bf16 %v1725_v13  ;;  %v1726_v18 = vunpack.i.l.bf16 %v1725_v13 }
 0x5c3   : > { %v1149_v58 = vsel %vm1147_vm10, %v849_v21, %v1727_v17  ;;  %v1148_v25 = vsel %vm1147_vm10, %v848_v20, %v1726_v18 }
 0x613   : > { %v1735_v19 = vpop.permute.xlu2 %1734 }
 0x614   : > { %v1737_v26 = vunpack.i.h.bf16 %v1735_v19  ;;  %v1736_v27 = vunpack.i.l.bf16 %v1735_v19 }
 0x61a   : > { %v1730_v22 = vpop.permute.xlu0 %1729 }
 0x61b   : > { %v1732_v23 = vunpack.i.h.bf16 %v1730_v22  ;;  %v1731_v24 = vunpack.i.l.bf16 %v1730_v22 }
 0x61d   : > { %v1152_v28 = vsel %vm1150_vm11, %v1149_v58, %v1732_v23  ;;  %v1151_v29 = vsel %vm1150_vm11, %v1148_v25, %v1731_v24 }
 0x61e   : > { %v1155_v30 = vsel %vm1153_vm12, %v1152_v28, %v1737_v26  ;;  %v1154_v31 = vsel %vm1153_vm12, %v1151_v29, %v1736_v27 }
 0x61f   : > { %v1608_v32 = vpack.c.bf16 %v1155_v30, %v1154_v31 }
 0x621   : > { %1609 = vst [vmem:[#allocation3] sm:$0xff] %v1608_v32  }
 0x628   : > { %v1595_v53 = vld [vmem:[#allocation3] sm:$0xff] }
 0x629   : > { %1240 = vmatmul.bf16.vlgmr.msra.gmra.mxu1 %v1595_v53 }
 0x6a6   : > { %v1241_v54 = vpop.f32.mrf.mxu1 }
 0x6a7   : > { %v1246_v35 = vadd.f32 %v1241_v54, %v2251_v0 }
 0x6a9   : > { %1248 = vst [vmem:[%s379_s16] sm:$0xff] %v1246_v35 }
 0x6ae   : > { %v1243_v36 = vpop.f32.mrf.mxu1 }
 0x6af   : > { %v1247_v38 = vadd.f32 %v1778_v37, %v1243_v36 }
 0x6b1   : > { %1249 = vst [vmem:[%s379_s16 + $0x8] sm:$0xff] %v1247_v38 }
 0x6b2   : > { %1986 = shalt.err (!%p1983_p9)
}
 0x6b3   : > { %s2058_s18 = smov 128   ;;  %s2059_s19 = smov 8  }
 0x6b4   : > { %1632 = dma.vmem_to_hbm [thread:$0]  (%p2192_p13), %s1264_s15, 256, %s1266_s22, %s1251_s8, %s2058_s18, %s2058_s18, %s2059_s19  }
 0x6b5 PF: > { %s1280_s29 = sand.u32 1, %s2025_s24   ;;  %p2462_p10 = scmp.ge.s32.totalorder %s2037_s27, 2 }
 0x6b6   : > { %s1281_s17 = scalar_lea.sflag [#allocation6], %s1280_s29 }
 0x6b7   : > { %p1655_p11 = pnand %p2462_p10, %p2197_p5 }
 0x6b9   : > { %p1656_p0 = pneg %p1655_p11 }
 0x6bb   : > { %2020 = dma.done.wait (%p1656_p0), %s1281_s17, 256  }
 0x6bc   : > { %2022 = vsyncadd (%p1656_p0), %s1281_s17, 4294967040  ;;  %p23_p2 = scmp.ge.s32.totalorder %s2172_s28, 4   ;;  %s2463_s24 = smov %s2029_s25 }
 0x6bd   : > { %s2464_s25 = smov %s2033_s26  ;;  %s2465_s26 = smov %s2184_s12 }
 0x6be   : > { %s2466_s27 = smov %s2172_s28  ;;  %25 = sbr.rel (!%p23_p2) target bundleno = 10 (0xa), region = 113 }
 0x6c3   :  { %1287 = vsyncpa [#allocation5], 1 }
 0x6c4   :  { %1289 = vsyncpa [#allocation5 + $0x1], 1 }
 0x6c5   :  { %1290 = vsyncpa [#allocation8], 1 }
 0x6c6   :  { %1291 = vsyncpa [#allocation11], 1 }
 0x6c7   :  { %1292 = vsyncpa [#allocation14], 1 }
 0x6c8   :  { %1293 = vsyncpa [#allocation6], 1 }
 0x6c9   :  { %1295 = vsyncpa [#allocation6 + $0x1], 1 }

</bundles_post_ra>
